<compile_context>
chip_gen: v7x
topology: tpu7x:2x2x1
jax: 0.10.0
libtpu: 0.0.40
codegen_flags: <defaults>
</compile_context>

<pallas_src>
import functools

import jax
import jax.numpy as jnp
import numpy as np
from jax.experimental import pallas as pl
from jax.experimental.pallas import tpu as pltpu


def _pointer_loss_kernel(x_ref, xp_ref, mask_ref,
                         wenc_ref, benc_ref, wqr_ref, wdr_ref, wk_ref, v_ref,
                         wencb_ref, bencb_ref, wkb_ref, vblk_ref,
                         loss_ref, *, tb, seq, emb, hid, p):
    """One grid step = TB batch elements.  Writes the summed CE loss of the step."""
    g = seq // p          # number of packed key groups
    ph = p * hid          # packed feature width (== 128 when hid divides 128)
    f32 = jnp.float32

    # ---- EDU encoder (stand-in for EduEmbeddingModel) ------------------------
    x2 = x_ref[...].reshape(tb * seq, emb)                       # (TB*SEQ, EMB)
    h2 = jnp.tanh(jnp.dot(x2, wenc_ref[...], preferred_element_type=f32)
                  + benc_ref[...])                               # (TB*SEQ, HID)
    h3 = h2.reshape(tb, seq, hid)                                # (TB, SEQ, HID)

    # masked mean over valid positions -> doc_embed
    mask_s = mask_ref[...]                                       # (TB, SEQ, 1)
    denom = jnp.maximum(jnp.sum(mask_s, axis=1), 1.0)            # (TB, 1)
    doc_embed = jnp.sum(h3 * mask_s, axis=1) / denom             # (TB, HID)

    # ---- PointerNet additive attention ---------------------------------------
    # lane-replicated query projection: q_rep[b, i, c*HID + h] == q[b, i, h]
    qr2 = jnp.dot(h2, wqr_ref[...], preferred_element_type=f32)  # (TB*SEQ, PH)
    d_rep = jnp.dot(doc_embed, wdr_ref[...],
                    preferred_element_type=f32)                  # (TB, PH)
    q_rep = qr2.reshape(tb, seq, ph) + d_rep[:, None, :]         # (TB, SEQ, PH)

    # packed keys: kp[b, g, c*HID + h] == k[b, g*P + c, h]
    xp2 = xp_ref[...].reshape(tb * g, p * emb)                   # (TB*G, P*EMB)
    hp2 = jnp.tanh(jnp.dot(xp2, wencb_ref[...], preferred_element_type=f32)
                   + bencb_ref[...])                             # (TB*G, PH)
    kp = jnp.dot(hp2, wkb_ref[...],
                 preferred_element_type=f32).reshape(tb, g, ph)  # (TB, G, PH)

    # lane-packed tanh of the additive scores (full 128-lane EUP utilisation)
    t = jnp.tanh(q_rep[:, :, None, :] + kp[:, None, :, :])       # (TB, SEQ, G, PH)
    # v contraction on the MXU via a block-diagonal v matrix
    sp = jnp.dot(t.reshape(tb * seq * g, ph), vblk_ref[...],
                 preferred_element_type=f32
                 ).reshape(tb, seq, g, p)                        # (TB, SEQ, G, P)

    # row-wise logsumexp over all key positions (padded keys included, matching
    # the reference / CrossEntropyLoss which only ignores rows, not columns)
    m = jnp.max(jnp.max(sp, axis=3), axis=2)                     # (TB, SEQ)
    e = jnp.exp(sp - m[:, :, None, None])
    se = jnp.sum(jnp.sum(e, axis=3), axis=2)                     # (TB, SEQ)
    lse = m + jnp.log(se)                                        # (TB, SEQ)

    # diagonal (target) logit computed directly: O(SEQ*HID), no iota/select
    k3 = jnp.dot(h2, wk_ref[...],
                 preferred_element_type=f32).reshape(tb, seq, hid)
    q_u = q_rep[:, :, 0:hid]                                     # un-replicated q
    diag = jnp.sum(jnp.tanh(q_u + k3) * v_ref[...][None, :, :],
                   axis=-1)                                      # (TB, SEQ)

    # CrossEntropy(reduction='sum', ignore_index=-100): rows i < doc_len, target=i
    mask_l = mask_ref[...][:, :, 0]                              # (TB, SEQ)
    row_loss = jnp.where(mask_l > 0.5, lse - diag, 0.0)
    loss_ref[...] = jnp.full(loss_ref.shape, jnp.sum(row_loss), loss_ref.dtype)


def pointer_net_model_forward(all_edus, doc_lengths, params):
    """all_edus: (B, SEQ, EMB) f32; doc_lengths: (B,) int32 -> scalar loss."""
    B, SEQ, EMB = all_edus.shape
    HID = params["w_enc"].shape[1]

    # key-packing factor: P key positions per 128-lane vreg when HID < 128
    if HID < 128 and 128 % HID == 0 and SEQ % (128 // HID) == 0:
        P = 128 // HID
    else:
        P = 1   # degenerate (unpacked) layout; packed inputs equal the plain ones
    G = SEQ // P
    PH = P * HID

    # batch-fusion tile (keeps TB*SEQ matmul rows around a few hundred)
    TB = max(1, min(B, max(1, 512 // SEQ), 16))
    num_steps = -(-B // TB)
    B_pad = num_steps * TB

    x = all_edus.astype(jnp.float32)
    dl = doc_lengths.astype(jnp.int32)
    if B_pad != B:      # zero-padded batch rows contribute exactly zero loss
        x = jnp.concatenate(
            [x, jnp.zeros((B_pad - B, SEQ, EMB), jnp.float32)], axis=0)
        dl = jnp.concatenate([dl, jnp.zeros((B_pad - B,), jnp.int32)], axis=0)

    mask = (jnp.arange(SEQ)[None, :] < dl[:, None]).astype(jnp.float32)
    mask = mask.reshape(B_pad, SEQ, 1)
    xp = x.reshape(B_pad, G, P * EMB)          # keys packed P-per-group (wrapper-side)

    w_enc, b_enc = params["w_enc"], params["b_enc"]
    w_q, w_k, w_d, v = params["w_q"], params["w_k"], params["w_d"], params["v"]

    eye_p = jnp.eye(P, dtype=jnp.float32)
    wq_rep = jnp.tile(w_q, (1, P))                     # (HID, PH)  lane-replicated q proj
    wd_rep = jnp.tile(w_d, (1, P))                     # (HID, PH)
    wenc_blk = jnp.kron(eye_p, w_enc)                  # (P*EMB, PH) block-diag encoder
    benc_blk = jnp.tile(b_enc, (1, P))                 # (1, PH)
    wk_blk = jnp.kron(eye_p, w_k)                      # (PH, PH)   block-diag key proj
    v_blk = jnp.kron(eye_p, v.reshape(HID, 1))         # (PH, P)    block-diag v

    kernel = functools.partial(_pointer_loss_kernel,
                               tb=TB, seq=SEQ, emb=EMB, hid=HID, p=P)

    def full(shape):
        return pl.BlockSpec(shape, lambda s, _n=len(shape): (0,) * _n)

    grid_spec = pltpu.PrefetchScalarGridSpec(
        num_scalar_prefetch=0,
        grid=(num_steps,),
        in_specs=[
            pl.BlockSpec((TB, SEQ, EMB), lambda s: (s, 0, 0)),      # x
            pl.BlockSpec((TB, G, P * EMB), lambda s: (s, 0, 0)),    # x (packed view)
            pl.BlockSpec((TB, SEQ, 1), lambda s: (s, 0, 0)),        # valid mask
            full((EMB, HID)),      # w_enc
            full((1, HID)),        # b_enc
            full((HID, PH)),       # wq_rep
            full((HID, PH)),       # wd_rep
            full((HID, HID)),      # w_k (for the diagonal term)
            full((1, HID)),        # v
            full((P * EMB, PH)),   # wenc_blk
            full((1, PH)),         # benc_blk
            full((PH, PH)),        # wk_blk
            full((PH, P)),         # v_blk
        ],
        out_specs=pl.BlockSpec((1, 8, 128), lambda s: (s, 0, 0)),
    )

    per_step = pl.pallas_call(
        kernel,
        grid_spec=grid_spec,
        out_shape=jax.ShapeDtypeStruct((num_steps, 8, 128), jnp.float32),
        compiler_params=pltpu.CompilerParams(
            dimension_semantics=("parallel",)),   # megacore-shardable on v7x
    )(x, xp, mask, w_enc, b_enc, wq_rep, wd_rep, w_k, v,
      wenc_blk, benc_blk, wk_blk, v_blk)

    # total_score = CE_sum / batch  (as in PointerNetModel.forward)
    return jnp.sum(per_step[:, 0, 0]) / B


def _reference_forward(all_edus, doc_lengths, params):
    B, SEQ, _ = all_edus.shape
    h = jnp.tanh(all_edus @ params["w_enc"] + params["b_enc"][0])
    mask = jnp.arange(SEQ)[None, :] < doc_lengths[:, None]
    d = (h * mask[..., None]).sum(1) / jnp.maximum(
        doc_lengths.astype(jnp.float32), 1.0)[:, None]
    q = h @ params["w_q"] + (d @ params["w_d"])[:, None, :]
    k = h @ params["w_k"]
    scores = (jnp.tanh(q[:, :, None, :] + k[:, None, :, :])
              * params["v"][0][None, None, None, :]).sum(-1)
    lse = jax.scipy.special.logsumexp(scores, axis=-1)
    diag = jnp.diagonal(scores, axis1=1, axis2=2)
    per_row = jnp.where(mask, lse - diag, 0.0)
    return per_row.sum() / B


def make_params(key, emb, hid):
    ks = jax.random.split(key, 6)
    s = 0.2
    return {
        "w_enc": s * jax.random.normal(ks[0], (emb, hid), jnp.float32),
        "b_enc": s * jax.random.normal(ks[1], (1, hid), jnp.float32),
        "w_q":   s * jax.random.normal(ks[2], (hid, hid), jnp.float32),
        "w_k":   s * jax.random.normal(ks[3], (hid, hid), jnp.float32),
        "w_d":   s * jax.random.normal(ks[4], (hid, hid), jnp.float32),
        "v":     s * jax.random.normal(ks[5], (1, hid), jnp.float32),
        # root_embed exists in the module but is unused in forward().
    }


if __name__ == "__main__":
    B, SEQ, EMB = 2, 8, 32
    LSTM_HID = 16
    HID = LSTM_HID * 2  # hid_dim = config[LSTM_HID] * 2

    key = jax.random.PRNGKey(0)
    k_x, k_p = jax.random.split(key)
    all_edus = jax.random.normal(k_x, (B, SEQ, EMB), jnp.float32)
    doc_lengths = jnp.array([SEQ, 5], dtype=jnp.int32)
    params = make_params(k_p, EMB, HID)

    loss = pointer_net_model_forward(all_edus, doc_lengths, params)
    loss = jax.block_until_ready(loss)

    ref = _reference_forward(all_edus, doc_lengths, params)
    np.testing.assert_allclose(np.asarray(loss), np.asarray(ref),
                               rtol=1e-4, atol=1e-4)
    print("KERNEL_OK")
</pallas_src>

<mosaic_0001>
module attributes {stable_mosaic.version = 11 : i64} {
  func.func @_pointer_loss_kernel(%arg0: i32, %arg1: memref<2x8x32xf32, #tpu.memory_space<vmem>>, %arg2: memref<2x2x128xf32, #tpu.memory_space<vmem>>, %arg3: memref<2x8x1xf32, #tpu.memory_space<vmem>>, %arg4: memref<32x32xf32, #tpu.memory_space<vmem>>, %arg5: memref<1x32xf32, #tpu.memory_space<vmem>>, %arg6: memref<32x128xf32, #tpu.memory_space<vmem>>, %arg7: memref<32x128xf32, #tpu.memory_space<vmem>>, %arg8: memref<32x32xf32, #tpu.memory_space<vmem>>, %arg9: memref<1x32xf32, #tpu.memory_space<vmem>>, %arg10: memref<128x128xf32, #tpu.memory_space<vmem>>, %arg11: memref<1x128xf32, #tpu.memory_space<vmem>>, %arg12: memref<128x128xf32, #tpu.memory_space<vmem>>, %arg13: memref<128x4xf32, #tpu.memory_space<vmem>>, %arg14: memref<1x8x128xf32, #tpu.memory_space<vmem>>) attributes {dimension_semantics = [#tpu.dimension_semantics<parallel>], iteration_bounds = array<i64: 1>, scalar_prefetch = 0 : i64, scratch_operands = 0 : i64, tpu.core_type = #tpu.core_type<tc>, window_params = [{transform_indices = @transform_0, window_bounds = array<i64: 2, 8, 32>}, {transform_indices = @transform_1, window_bounds = array<i64: 2, 2, 128>}, {transform_indices = @transform_2, window_bounds = array<i64: 2, 8, 1>}, {pipeline_mode = #tpu.pipeline_mode<synchronous>, transform_indices = @transform_3, window_bounds = array<i64: 32, 32>}, {pipeline_mode = #tpu.pipeline_mode<synchronous>, transform_indices = @transform_4, window_bounds = array<i64: 1, 32>}, {pipeline_mode = #tpu.pipeline_mode<synchronous>, transform_indices = @transform_5, window_bounds = array<i64: 32, 128>}, {pipeline_mode = #tpu.pipeline_mode<synchronous>, transform_indices = @transform_6, window_bounds = array<i64: 32, 128>}, {pipeline_mode = #tpu.pipeline_mode<synchronous>, transform_indices = @transform_7, window_bounds = array<i64: 32, 32>}, {pipeline_mode = #tpu.pipeline_mode<synchronous>, transform_indices = @transform_8, window_bounds = array<i64: 1, 32>}, {pipeline_mode = #tpu.pipeline_mode<synchronous>, transform_indices = @transform_9, window_bounds = array<i64: 128, 128>}, {pipeline_mode = #tpu.pipeline_mode<synchronous>, transform_indices = @transform_10, window_bounds = array<i64: 1, 128>}, {pipeline_mode = #tpu.pipeline_mode<synchronous>, transform_indices = @transform_11, window_bounds = array<i64: 128, 128>}, {pipeline_mode = #tpu.pipeline_mode<synchronous>, transform_indices = @transform_12, window_bounds = array<i64: 128, 4>}, {transform_indices = @transform_13, window_bounds = array<i64: 1, 8, 128>}]} {
    %c0 = arith.constant 0 : index
    %c0_0 = arith.constant 0 : index
    %c0_1 = arith.constant 0 : index
    %0 = vector.load %arg1[%c0, %c0_0, %c0_1] : memref<2x8x32xf32, #tpu.memory_space<vmem>>, vector<2x8x32xf32>
    %1 = vector.shape_cast %0 : vector<2x8x32xf32> to vector<16x32xf32>
    %c0_2 = arith.constant 0 : index
    %c0_3 = arith.constant 0 : index
    %2 = vector.load %arg4[%c0_2, %c0_3] : memref<32x32xf32, #tpu.memory_space<vmem>>, vector<32x32xf32>
    %cst = arith.constant dense<0.000000e+00> : vector<16x32xf32>
    %3 = tpu.matmul %1, %2, %cst {dimension_numbers = #tpu.dot_dimension_numbers<[1], [0], [0], [1], [0, 0, 1, 1], [], []>} : vector<16x32xf32>, vector<32x32xf32>, vector<16x32xf32> -> vector<16x32xf32>
    %c0_4 = arith.constant 0 : index
    %c0_5 = arith.constant 0 : index
    %4 = vector.load %arg5[%c0_4, %c0_5] : memref<1x32xf32, #tpu.memory_space<vmem>>, vector<1x32xf32>
    %5 = vector.broadcast %4 : vector<1x32xf32> to vector<16x32xf32>
    %6 = arith.addf %3, %5 : vector<16x32xf32>
    %7 = math.tanh %6 : vector<16x32xf32>
    %8 = vector.shape_cast %7 : vector<16x32xf32> to vector<2x8x32xf32>
    %c0_6 = arith.constant 0 : index
    %c0_7 = arith.constant 0 : index
    %c0_8 = arith.constant 0 : index
    %9 = vector.load %arg3[%c0_6, %c0_7, %c0_8] : memref<2x8x1xf32, #tpu.memory_space<vmem>>, vector<2x8x1xf32>
    %cst_9 = arith.constant dense<0.000000e+00> : vector<2x1xf32>
    %10 = vector.multi_reduction <add>, %9, %cst_9 [1] : vector<2x8x1xf32> to vector<2x1xf32>
    %cst_10 = arith.constant 1.000000e+00 : f32
    %11 = vector.broadcast %cst_10 : f32 to vector<2x1xf32>
    %12 = arith.maximumf %10, %11 : vector<2x1xf32>
    %13 = vector.broadcast %9 : vector<2x8x1xf32> to vector<2x8x32xf32>
    %14 = arith.mulf %8, %13 : vector<2x8x32xf32>
    %cst_11 = arith.constant dense<0.000000e+00> : vector<2x32xf32>
    %15 = vector.multi_reduction <add>, %14, %cst_11 [1] : vector<2x8x32xf32> to vector<2x32xf32>
    %16 = vector.broadcast %12 : vector<2x1xf32> to vector<2x32xf32>
    %17 = arith.divf %15, %16 : vector<2x32xf32>
    %c0_12 = arith.constant 0 : index
    %c0_13 = arith.constant 0 : index
    %18 = vector.load %arg6[%c0_12, %c0_13] : memref<32x128xf32, #tpu.memory_space<vmem>>, vector<32x128xf32>
    %cst_14 = arith.constant dense<0.000000e+00> : vector<16x128xf32>
    %19 = tpu.matmul %7, %18, %cst_14 {dimension_numbers = #tpu.dot_dimension_numbers<[1], [0], [0], [1], [0, 0, 1, 1], [], []>} : vector<16x32xf32>, vector<32x128xf32>, vector<16x128xf32> -> vector<16x128xf32>
    %c0_15 = arith.constant 0 : index
    %c0_16 = arith.constant 0 : index
    %20 = vector.load %arg7[%c0_15, %c0_16] : memref<32x128xf32, #tpu.memory_space<vmem>>, vector<32x128xf32>
    %cst_17 = arith.constant dense<0.000000e+00> : vector<2x128xf32>
    %21 = tpu.matmul %17, %20, %cst_17 {dimension_numbers = #tpu.dot_dimension_numbers<[1], [0], [0], [1], [0, 0, 1, 1], [], []>} : vector<2x32xf32>, vector<32x128xf32>, vector<2x128xf32> -> vector<2x128xf32>
    %22 = vector.shape_cast %19 : vector<16x128xf32> to vector<2x8x128xf32>
    %23 = vector.shape_cast %21 : vector<2x128xf32> to vector<2x1x128xf32>
    %24 = vector.broadcast %23 : vector<2x1x128xf32> to vector<2x8x128xf32>
    %25 = arith.addf %22, %24 : vector<2x8x128xf32>
    %c0_18 = arith.constant 0 : index
    %c0_19 = arith.constant 0 : index
    %c0_20 = arith.constant 0 : index
    %26 = vector.load %arg2[%c0_18, %c0_19, %c0_20] : memref<2x2x128xf32, #tpu.memory_space<vmem>>, vector<2x2x128xf32>
    %27 = vector.shape_cast %26 : vector<2x2x128xf32> to vector<4x128xf32>
    %c0_21 = arith.constant 0 : index
    %c0_22 = arith.constant 0 : index
    %28 = vector.load %arg10[%c0_21, %c0_22] : memref<128x128xf32, #tpu.memory_space<vmem>>, vector<128x128xf32>
    %cst_23 = arith.constant dense<0.000000e+00> : vector<4x128xf32>
    %29 = tpu.matmul %27, %28, %cst_23 {dimension_numbers = #tpu.dot_dimension_numbers<[1], [0], [0], [1], [0, 0, 1, 1], [], []>} : vector<4x128xf32>, vector<128x128xf32>, vector<4x128xf32> -> vector<4x128xf32>
    %c0_24 = arith.constant 0 : index
    %c0_25 = arith.constant 0 : index
    %30 = vector.load %arg11[%c0_24, %c0_25] : memref<1x128xf32, #tpu.memory_space<vmem>>, vector<1x128xf32>
    %31 = vector.broadcast %30 : vector<1x128xf32> to vector<4x128xf32>
    %32 = arith.addf %29, %31 : vector<4x128xf32>
    %33 = math.tanh %32 : vector<4x128xf32>
    %c0_26 = arith.constant 0 : index
    %c0_27 = arith.constant 0 : index
    %34 = vector.load %arg12[%c0_26, %c0_27] : memref<128x128xf32, #tpu.memory_space<vmem>>, vector<128x128xf32>
    %cst_28 = arith.constant dense<0.000000e+00> : vector<4x128xf32>
    %35 = tpu.matmul %33, %34, %cst_28 {dimension_numbers = #tpu.dot_dimension_numbers<[1], [0], [0], [1], [0, 0, 1, 1], [], []>} : vector<4x128xf32>, vector<128x128xf32>, vector<4x128xf32> -> vector<4x128xf32>
    %36 = vector.shape_cast %35 : vector<4x128xf32> to vector<2x2x128xf32>
    %37 = vector.shape_cast %25 : vector<2x8x128xf32> to vector<2x8x1x128xf32>
    %38 = vector.shape_cast %36 : vector<2x2x128xf32> to vector<2x1x2x128xf32>
    %39 = vector.broadcast %37 : vector<2x8x1x128xf32> to vector<2x8x2x128xf32>
    %40 = vector.broadcast %38 : vector<2x1x2x128xf32> to vector<2x8x2x128xf32>
    %41 = arith.addf %39, %40 : vector<2x8x2x128xf32>
    %42 = math.tanh %41 : vector<2x8x2x128xf32>
    %43 = vector.shape_cast %42 : vector<2x8x2x128xf32> to vector<32x128xf32>
    %c0_29 = arith.constant 0 : index
    %c0_30 = arith.constant 0 : index
    %44 = vector.load %arg13[%c0_29, %c0_30] : memref<128x4xf32, #tpu.memory_space<vmem>>, vector<128x4xf32>
    %cst_31 = arith.constant dense<0.000000e+00> : vector<32x4xf32>
    %45 = tpu.matmul %43, %44, %cst_31 {dimension_numbers = #tpu.dot_dimension_numbers<[1], [0], [0], [1], [0, 0, 1, 1], [], []>} : vector<32x128xf32>, vector<128x4xf32>, vector<32x4xf32> -> vector<32x4xf32>
    %46 = vector.shape_cast %45 : vector<32x4xf32> to vector<2x8x2x4xf32>
    %cst_32 = arith.constant dense<0xFF800000> : vector<2x8x2xf32>
    %47 = vector.multi_reduction <maximumf>, %46, %cst_32 [3] : vector<2x8x2x4xf32> to vector<2x8x2xf32>
    %cst_33 = arith.constant dense<0xFF800000> : vector<2x8xf32>
    %48 = vector.multi_reduction <maximumf>, %47, %cst_33 [2] : vector<2x8x2xf32> to vector<2x8xf32>
    %49 = vector.shape_cast %48 : vector<2x8xf32> to vector<2x8x1x1xf32>
    %50 = vector.broadcast %49 : vector<2x8x1x1xf32> to vector<2x8x2x4xf32>
    %51 = arith.subf %46, %50 : vector<2x8x2x4xf32>
    %52 = math.exp %51 : vector<2x8x2x4xf32>
    %cst_34 = arith.constant dense<0.000000e+00> : vector<2x8x2xf32>
    %53 = vector.multi_reduction <add>, %52, %cst_34 [3] : vector<2x8x2x4xf32> to vector<2x8x2xf32>
    %cst_35 = arith.constant dense<0.000000e+00> : vector<2x8xf32>
    %54 = vector.multi_reduction <add>, %53, %cst_35 [2] : vector<2x8x2xf32> to vector<2x8xf32>
    %55 = math.log %54 : vector<2x8xf32>
    %56 = arith.addf %48, %55 : vector<2x8xf32>
    %c0_36 = arith.constant 0 : index
    %c0_37 = arith.constant 0 : index
    %57 = vector.load %arg8[%c0_36, %c0_37] : memref<32x32xf32, #tpu.memory_space<vmem>>, vector<32x32xf32>
    %cst_38 = arith.constant dense<0.000000e+00> : vector<16x32xf32>
    %58 = tpu.matmul %7, %57, %cst_38 {dimension_numbers = #tpu.dot_dimension_numbers<[1], [0], [0], [1], [0, 0, 1, 1], [], []>} : vector<16x32xf32>, vector<32x32xf32>, vector<16x32xf32> -> vector<16x32xf32>
    %59 = vector.shape_cast %58 : vector<16x32xf32> to vector<2x8x32xf32>
    %60 = vector.extract_strided_slice %25 {offsets = [0, 0, 0], sizes = [2, 8, 32], strides = [1, 1, 1]} : vector<2x8x128xf32> to vector<2x8x32xf32>
    %61 = arith.addf %60, %59 : vector<2x8x32xf32>
    %62 = math.tanh %61 : vector<2x8x32xf32>
    %c0_39 = arith.constant 0 : index
    %c0_40 = arith.constant 0 : index
    %63 = vector.load %arg9[%c0_39, %c0_40] : memref<1x32xf32, #tpu.memory_space<vmem>>, vector<1x32xf32>
    %64 = vector.shape_cast %63 : vector<1x32xf32> to vector<1x1x32xf32>
    %65 = vector.broadcast %64 : vector<1x1x32xf32> to vector<2x8x32xf32>
    %66 = arith.mulf %62, %65 : vector<2x8x32xf32>
    %cst_41 = arith.constant dense<0.000000e+00> : vector<2x8xf32>
    %67 = vector.multi_reduction <add>, %66, %cst_41 [2] : vector<2x8x32xf32> to vector<2x8xf32>
    %c0_42 = arith.constant 0 : index
    %c0_43 = arith.constant 0 : index
    %c0_44 = arith.constant 0 : index
    %68 = vector.load %arg3[%c0_42, %c0_43, %c0_44] : memref<2x8x1xf32, #tpu.memory_space<vmem>>, vector<2x8x1xf32>
    %69 = vector.shape_cast %68 : vector<2x8x1xf32> to vector<2x8xf32>
    %cst_45 = arith.constant 5.000000e-01 : f32
    %70 = vector.broadcast %cst_45 : f32 to vector<2x8xf32>
    %71 = arith.cmpf ogt, %69, %70 : vector<2x8xf32>
    %72 = arith.subf %56, %67 : vector<2x8xf32>
    %cst_46 = arith.constant 0.000000e+00 : f32
    %73 = vector.broadcast %cst_46 : f32 to vector<2x8xf32>
    %74 = arith.select %71, %72, %73 : vector<2x8xi1>, vector<2x8xf32>
    %75 = vector.shape_cast %74 : vector<2x8xf32> to vector<1x2x8xf32>
    %cst_47 = arith.constant dense<0.000000e+00> : vector<1xf32>
    %76 = vector.multi_reduction <add>, %75, %cst_47 [1, 2] : vector<1x2x8xf32> to vector<1xf32>
    %77 = vector.shape_cast %76 : vector<1xf32> to vector<1x1x1xf32>
    %78 = vector.extract %77[0, 0, 0] : f32 from vector<1x1x1xf32>
    %79 = vector.broadcast %78 : f32 to vector<1x8x128xf32>
    %c0_48 = arith.constant 0 : index
    %c0_49 = arith.constant 0 : index
    %c0_50 = arith.constant 0 : index
    %80 = vector.load %arg14[%c0_48, %c0_49, %c0_50] : memref<1x8x128xf32, #tpu.memory_space<vmem>>, vector<1x8x128xf32>
    tpu.vector_store %arg14[%c0_48, %c0_49, %c0_50], %79 {strides = array<i32>} : memref<1x8x128xf32, #tpu.memory_space<vmem>>, vector<1x8x128xf32>,
    return
  }
  func.func @transform_0(%arg0: i32) -> (i32, i32, i32) {
    %c0_i32 = arith.constant 0 : i32
    %c0_i32_0 = arith.constant 0 : i32
    %c0_i32_1 = arith.constant 0 : i32
    return %arg0, %c0_i32, %c0_i32_0 : i32, i32, i32
  }
  func.func @transform_1(%arg0: i32) -> (i32, i32, i32) {
    %c0_i32 = arith.constant 0 : i32
    %c0_i32_0 = arith.constant 0 : i32
    %c0_i32_1 = arith.constant 0 : i32
    return %arg0, %c0_i32, %c0_i32_0 : i32, i32, i32
  }
  func.func @transform_2(%arg0: i32) -> (i32, i32, i32) {
    %c0_i32 = arith.constant 0 : i32
    %c0_i32_0 = arith.constant 0 : i32
    %c0_i32_1 = arith.constant 0 : i32
    return %arg0, %c0_i32, %c0_i32_0 : i32, i32, i32
  }
  func.func @transform_3(%arg0: i32) -> (i32, i32) {
    %c0_i32 = arith.constant 0 : i32
    %c0_i32_0 = arith.constant 0 : i32
    %c0_i32_1 = arith.constant 0 : i32
    return %c0_i32, %c0_i32_0 : i32, i32
  }
  func.func @transform_4(%arg0: i32) -> (i32, i32) {
    %c0_i32 = arith.constant 0 : i32
    %c0_i32_0 = arith.constant 0 : i32
    %c0_i32_1 = arith.constant 0 : i32
    return %c0_i32, %c0_i32_0 : i32, i32
  }
  func.func @transform_5(%arg0: i32) -> (i32, i32) {
    %c0_i32 = arith.constant 0 : i32
    %c0_i32_0 = arith.constant 0 : i32
    %c0_i32_1 = arith.constant 0 : i32
    return %c0_i32, %c0_i32_0 : i32, i32
  }
  func.func @transform_6(%arg0: i32) -> (i32, i32) {
    %c0_i32 = arith.constant 0 : i32
    %c0_i32_0 = arith.constant 0 : i32
    %c0_i32_1 = arith.constant 0 : i32
    return %c0_i32, %c0_i32_0 : i32, i32
  }
  func.func @transform_7(%arg0: i32) -> (i32, i32) {
    %c0_i32 = arith.constant 0 : i32
    %c0_i32_0 = arith.constant 0 : i32
    %c0_i32_1 = arith.constant 0 : i32
    return %c0_i32, %c0_i32_0 : i32, i32
  }
  func.func @transform_8(%arg0: i32) -> (i32, i32) {
    %c0_i32 = arith.constant 0 : i32
    %c0_i32_0 = arith.constant 0 : i32
    %c0_i32_1 = arith.constant 0 : i32
    return %c0_i32, %c0_i32_0 : i32, i32
  }
  func.func @transform_9(%arg0: i32) -> (i32, i32) {
    %c0_i32 = arith.constant 0 : i32
    %c0_i32_0 = arith.constant 0 : i32
    %c0_i32_1 = arith.constant 0 : i32
    return %c0_i32, %c0_i32_0 : i32, i32
  }
  func.func @transform_10(%arg0: i32) -> (i32, i32) {
    %c0_i32 = arith.constant 0 : i32
    %c0_i32_0 = arith.constant 0 : i32
    %c0_i32_1 = arith.constant 0 : i32
    return %c0_i32, %c0_i32_0 : i32, i32
  }
  func.func @transform_11(%arg0: i32) -> (i32, i32) {
    %c0_i32 = arith.constant 0 : i32
    %c0_i32_0 = arith.constant 0 : i32
    %c0_i32_1 = arith.constant 0 : i32
    return %c0_i32, %c0_i32_0 : i32, i32
  }
  func.func @transform_12(%arg0: i32) -> (i32, i32) {
    %c0_i32 = arith.constant 0 : i32
    %c0_i32_0 = arith.constant 0 : i32
    %c0_i32_1 = arith.constant 0 : i32
    return %c0_i32, %c0_i32_0 : i32, i32
  }
  func.func @transform_13(%arg0: i32) -> (i32, i32, i32) {
    %c0_i32 = arith.constant 0 : i32
    %c0_i32_0 = arith.constant 0 : i32
    %c0_i32_1 = arith.constant 0 : i32
    return %arg0, %c0_i32, %c0_i32_0 : i32, i32, i32
  }
}

</mosaic_0001>

<bundles_post_ra>
// kernel: tpu_custom_call.1
= control target key start
LH: loop header
LB: loop body
LE: loop exit
PB: predicated region body
PF: predicated region fallthrough
CT: control target
= control target key end

     0   :  { %18 = vsyncpa [#allocation3], 0  ;;  %s2949_s0 = inlined_call_operand.vmem [shape: f32[2,8,32], index: 0, kind: input, shape index: {}]   ;;  %s2950_s1 = inlined_call_operand.vmem [shape: f32[2,2,128], index: 1, kind: input, shape index: {}]   ;;  %s2951_s2 = inlined_call_operand.vmem [shape: f32[2,8,1], index: 2, kind: input, shape index: {}]   ;;  %s2952_s3 = inlined_call_operand.vmem [shape: f32[32,32], index: 3, kind: input, shape index: {}]   ;;  %s2953_s4 = inlined_call_operand.vmem [shape: f32[1,32], index: 4, kind: input, shape index: {}]   ;;  %s2954_s5 = inlined_call_operand.hbm [shape: f32[32,128], index: 5, kind: input, shape index: {}]   ;;  %s2955_s6 = inlined_call_operand.hbm [shape: f32[32,128], index: 6, kind: input, shape index: {}]   ;;  %s2956_s7 = inlined_call_operand.hbm [shape: f32[32,32], index: 7, kind: input, shape index: {}]   ;;  %s2957_s8 = inlined_call_operand.vmem [shape: f32[1,32], index: 8, kind: input, shape index: {}]   ;;  %s2958_s9 = inlined_call_operand.vmem [shape: f32[128,128], index: 9, kind: input, shape index: {}]   ;;  %s2959_s10 = inlined_call_operand.vmem [shape: f32[1,128], index: 10, kind: input, shape index: {}]   ;;  %s2960_s11 = inlined_call_operand.hbm [shape: f32[128,128], index: 11, kind: input, shape index: {}]   ;;  %s2961_s12 = inlined_call_operand.vmem [shape: f32[128,4], index: 12, kind: input, shape index: {}]   ;;  %s2962_s13 = inlined_call_operand.hbm [shape: f32[1,8,128], index: 13, kind: output, shape index: {}]  }
   0x1   :  { %19 = vsyncpa [#allocation6], 0 }
   0x2   :  { %20 = vsyncpa [#allocation9], 0 }
   0x3   :  { %21 = vsyncpa [#allocation4], 0  ;;  %s2315_s25 = smov [#allocation5]   ;;  %s2316_s27 = smov [#allocation2]  }
   0x4   :  { %s49_s26 = sshll.u32 %s2315_s25, 4  ;;  %s37_s28 = sshll.u32 %s2316_s27, 4  ;;  %s50_s26 = int_to_ptr.vmem [resolvable:$true] %s49_s26  ;;  %s2398_s28 = int_to_ptr.vmem [resolvable:$true] %s37_s28 }
   0x5   :  { %s2197_s14 = scalar_lea.hbm %s2955_s6, 512 }
   0x6   :  { %p2198_p0 = scmp.ne.s32.totalorder %s2955_s6, %s2197_s14  ;;  %p2201_p1 = scmp.lt.u32.totalorder %s2197_s14, %s2955_s6 }
   0x8   :  { %p2203_p2 = pnand %p2201_p1, %p2198_p0 }
   0xa   :  { %2206 = shalt.err (!%p2203_p2)
}
   0xb   :  { %s2207_s19 = scalar_lea.vmem %s50_s26, 512  ;;  %p2212_p4 = scmp.lt.s32.totalorder %s50_s26, %s50_s26 }
   0xc   :  { %p2208_p3 = scmp.ne.s32.totalorder %s50_s26, %s2207_s19  ;;  %p2213_p5 = scmp.lt.s32.totalorder %s2207_s19, %s2207_s19 }
   0xe   :  { %p2214_p6 = por %p2213_p5, %p2212_p4 }
  0x10   :  { %p2215_p7 = pnand %p2214_p6, %p2208_p3 }
  0x12   :  { %2218 = shalt.err (!%p2215_p7)
}
  0x13   :  { %s2317_s20 = smov 128   ;;  %s2318_s21 = smov 8  }
  0x14   :  { %55 = dma.hbm_to_vmem [thread:$0]  %s2955_s6, 512, %s50_s26, [#allocation6], %s2317_s20, %s2317_s20, %s2318_s21  }
  0x15   :  { %s2219_s27 = scalar_lea.hbm %s2954_s5, 512 }
  0x16   :  { %p2220_p8 = scmp.ne.s32.totalorder %s2954_s5, %s2219_s27  ;;  %p2223_p9 = scmp.lt.u32.totalorder %s2219_s27, %s2954_s5 }
  0x18   :  { %p2225_p10 = pnand %p2223_p9, %p2220_p8 }
  0x1a   :  { %2228 = shalt.err (!%p2225_p10)
}
  0x1b   :  { %s2229_s16 = scalar_lea.vmem %s2398_s28, 512  ;;  %p2234_p12 = scmp.lt.s32.totalorder %s2398_s28, %s2398_s28 }
  0x1c   :  { %p2230_p11 = scmp.ne.s32.totalorder %s2398_s28, %s2229_s16  ;;  %p2235_p13 = scmp.lt.s32.totalorder %s2229_s16, %s2229_s16 }
  0x1e   :  { %p2236_p0 = por %p2235_p13, %p2234_p12 }
  0x20   :  { %p2237_p1 = pnand %p2236_p0, %p2230_p11 }
  0x22   :  { %2240 = shalt.err (!%p2237_p1)
}
  0x23   :  { %43 = dma.hbm_to_vmem [thread:$0]  %s2954_s5, 512, %s2398_s28, [#allocation3], %s2317_s20, %s2317_s20, %s2318_s21  }
  0x24   :  { %s2319_s17 = smov [#allocation7]   ;;  %s2320_s19 = smov [#allocation8]  }
  0x25   :  { %s61_s18 = sshll.u32 %s2319_s17, 4  ;;  %s79_s22 = sshll.u32 %s2320_s19, 4  ;;  %s62_s18 = int_to_ptr.vmem [resolvable:$true] %s61_s18  ;;  %s2435_s22 = int_to_ptr.vmem [resolvable:$true] %s79_s22 }
  0x26   :  { %s2241_s25 = scalar_lea.hbm %s2956_s7, 512 }
  0x27   :  { %p2242_p2 = scmp.ne.s32.totalorder %s2956_s7, %s2241_s25  ;;  %p2245_p3 = scmp.lt.u32.totalorder %s2241_s25, %s2956_s7 }
  0x29   :  { %p2247_p4 = pnand %p2245_p3, %p2242_p2 }
  0x2b   :  { %2250 = shalt.err (!%p2247_p4)
}
  0x2c   :  { %s2251_s5 = scalar_lea.vmem %s62_s18, 512  ;;  %p2256_p6 = scmp.lt.s32.totalorder %s62_s18, %s62_s18 }
  0x2d   :  { %p2252_p5 = scmp.ne.s32.totalorder %s62_s18, %s2251_s5  ;;  %p2257_p7 = scmp.lt.s32.totalorder %s2251_s5, %s2251_s5 }
  0x2f   :  { %p2258_p8 = por %p2257_p7, %p2256_p6 }
  0x31   :  { %p2259_p9 = pnand %p2258_p8, %p2252_p5 }
  0x33   :  { %2262 = shalt.err (!%p2259_p9)
}
  0x34   :  { %67 = dma.hbm_to_vmem [thread:$0]  %s2956_s7, 512, %s62_s18, [#allocation6], %s2317_s20, %s2317_s20, %s2318_s21  }
  0x35   :  { %s2263_s26 = scalar_lea.hbm %s2960_s11, 2048 }
  0x36   :  { %p2264_p10 = scmp.ne.s32.totalorder %s2960_s11, %s2263_s26  ;;  %p2267_p11 = scmp.lt.u32.totalorder %s2263_s26, %s2960_s11 }
  0x38   :  { %p2269_p12 = pnand %p2267_p11, %p2264_p10 }
  0x3a   :  { %2272 = shalt.err (!%p2269_p12)
}
  0x3b   :  { %s2273_s25 = scalar_lea.vmem %s2435_s22, 2048  ;;  %p2278_p0 = scmp.lt.s32.totalorder %s2435_s22, %s2435_s22 }
  0x3c   :  { %p2274_p13 = scmp.ne.s32.totalorder %s2435_s22, %s2273_s25  ;;  %p2279_p1 = scmp.lt.s32.totalorder %s2273_s25, %s2273_s25 }
  0x3e   :  { %p2280_p2 = por %p2279_p1, %p2278_p0 }
  0x40   :  { %p2281_p3 = pnand %p2280_p2, %p2274_p13 }
  0x42   :  { %2284 = shalt.err (!%p2281_p3)
}
  0x43   :  { %85 = dma.hbm_to_vmem [thread:$0]  %s2960_s11, 2048, %s2435_s22, [#allocation9], %s2317_s20, %s2317_s20, %s2318_s21  }
  0x44   :  { %2307 = dma.done.wait [#allocation3], 512  }
  0x45   :  { %2308 = vsyncadd [#allocation3], 4294966784 }
  0x46   :  { %2309 = dma.done.wait [#allocation6], 1024  }
  0x47   :  { %2310 = vsyncadd [#allocation6], 4294966272 }
  0x48   :  { %2311 = dma.done.wait [#allocation9], 2048  }
  0x49   :  { %2312 = vsyncadd [#allocation9], 4294965248  ;;  %v2321_v0 = vmov 0.0|0.0   ;;  %vm2322_vm0 = vmmov 0   ;;  %v2323_v1 = vmov 0.0   ;;  %v2324_v2 = vmov 0  }
  0x4a   :  { %2008 = vmatprep.subr.bf16.mxu1 %v2321_v0  ;;  %1899 = vmatprep.mubr.msk.f32.mxu1 %vm2322_vm0, %v2323_v1  ;;  %vm113_vm1 = vcmask 261120   ;;  %v102_v3 = vld [vmem:[%s2952_s3] sm:$0xff]  ;;  %v103_v4 = vld [vmem:[%s2952_s3 + $0x8] sm:$0xff]  ;;  %v104_v5 = vld [vmem:[%s2952_s3 + $0x10] sm:$0xff]  ;;  %vm199_vm2 = vcmask 7168   ;;  %v425_v42 = vlaneseq  ;;  %vm347_vm3 = vcmask 1041409  }
  0x4b   :  { %2111 = vset.pattern.permute.xlu0 %v2324_v2  ;;  %2112 = vset.pattern.permute.xlu1 %v2324_v2  ;;  %v1986_v6 = vpack.c.bf16 %v103_v4, %v102_v3  ;;  %v105_v7 = vld [vmem:[%s2952_s3 + $0x18] sm:$0xff]  ;;  %v100_v8 = vld [vmem:[%s2949_s0] sm:$0xff]  ;;  %v459_v11 = vld [vmem:[%s2958_s9 + $0x8] sm:$0xff]  ;;  %v2325_v43 = vmov 1983009808   ;;  %vm1149_vm4 = vcmask 25600  }
  0x4c   :  { %v1990_v9 = vpack.c.bf16 %v105_v7, %v104_v5  ;;  %1842 = vmatprep.mubr.msk.f32.mxu0 %vm113_vm1, %v100_v8  ;;  %v458_v10 = vld [vmem:[%s2958_s9] sm:$0xff]  ;;  %v460_v12 = vld [vmem:[%s2958_s9 + $0x10] sm:$0xff]  ;;  %v461_v14 = vld [vmem:[%s2958_s9 + $0x18] sm:$0xff]  ;;  %v485_v44 = vunpack.c.l.s4 %v2325_v43  ;;  %v2549_v51 = vshrl.u32 %v425_v42, 7  ;;  %vm1281_vm5 = vcmask 1042434  }
  0x4d   :  { %1987 = vmatprep.subr.bf16.mxu0 %v1986_v6  ;;  %v2009_v13 = vpack.c.bf16 %v459_v11, %v458_v10  ;;  %v2012_v15 = vpack.c.bf16 %v461_v14, %v460_v12  ;;  %v462_v16 = vld [vmem:[%s2958_s9 + $0x20] sm:$0xff]  ;;  %v463_v17 = vld [vmem:[%s2958_s9 + $0x28] sm:$0xff]  ;;  %v464_v24 = vld [vmem:[%s2958_s9 + $0x30] sm:$0xff]  ;;  %vm1283_vm6 = vcmask 1043459   ;;  %vm1285_vm7 = vcmask 1044484  }
  0x4e   :  { %1989 = vmatpush3.bf16.msra.mxu0 %v1986_v6  ;;  %v101_v18 = vld [vmem:[%s2949_s0 + $0x8] sm:$0xff]  ;;  %v197_v19 = vld [vmem:[%s2951_s2] sm:$0xff]  ;;  %v2015_v21 = vpack.c.bf16 %v463_v17, %v462_v16  ;;  %v465_v25 = vld [vmem:[%s2958_s9 + $0x38] sm:$0xff]  ;;  %v486_v52 = vunpack.c.0.s8 %v485_v44  ;;  %vm1287_vm8 = vcmask 1045509   ;;  %vm1289_vm9 = vcmask 1046534  }
  0x4f   :  { %1991 = vmatprep.subr.bf16.mxu0 %v1990_v9  ;;  %2010 = vmatpush3.bf16.msra.mxu1 %v2009_v13  ;;  %v198_v20 = vld [vmem:[%s2951_s2 + $0x8] sm:$0xff]  ;;  %v200_v22 = vsel %vm199_vm2, %v197_v19, 0.0  ;;  %v2018_v30 = vpack.c.bf16 %v465_v25, %v464_v24  ;;  %v466_v31 = vld [vmem:[%s2958_s9 + $0x40] sm:$0xff]  ;;  %v468_v38 = vld [vmem:[%s2958_s9 + $0x50] sm:$0xff]  ;;  %vm1291_vm10 = vcmask 1047559   ;;  %vm1302_vm11 = vcmask 15360  }
  0x50   :  { %2011 = vmatprep.subr.bf16.mxu1 %v2321_v0  ;;  %218 = vperm.xlu0 %2111, %v197_v19   ;;  %v207_v23 = vsel %vm199_vm2, %v198_v20, 0.0  ;;  %v201_v26 = vrot.slane %v200_v22, 4  ;;  %v467_v32 = vld [vmem:[%s2958_s9 + $0x48] sm:$0xff]  ;;  %v469_v39 = vld [vmem:[%s2958_s9 + $0x58] sm:$0xff]  ;;  %v470_v48 = vld [vmem:[%s2958_s9 + $0x60] sm:$0xff]  ;;  %v2565_v60 = vsub.s32 %v486_v52, %v2549_v51  ;;  %vm1717_vm14 = vcmask 58368  }
  0x51   :  { %v208_v27 = vrot.slane %v207_v23, 4  ;;  %v2021_v37 = vpack.c.bf16 %v467_v32, %v466_v31  ;;  %v2024_v47 = vpack.c.bf16 %v469_v39, %v468_v38  ;;  %v471_v49 = vld [vmem:[%s2958_s9 + $0x68] sm:$0xff]  ;;  %v456_v55 = vld [vmem:[%s2950_s1] sm:$0x3]  ;;  %v457_v56 = vld [vmem:[%s2950_s1 + $0x2] sm:$0x3] }
  0x52   :  { %1993 = vmatpush3.bf16.msra.mxu0 %v1990_v9  ;;  %v202_v28 = vadd.f32 %v201_v26, %v200_v22  ;;  %v2027_v54 = vpack.c.bf16 %v471_v49, %v470_v48  ;;  %v472_v57 = vld [vmem:[%s2958_s9 + $0x70] sm:$0xff]  ;;  %v473_v58 = vld [vmem:[%s2958_s9 + $0x78] sm:$0xff]  ;;  %v483_v59 = vcombine.low %v456_v55, %v457_v56  ;;  %v256_v63 = vld [vmem:[#allocation2] sm:$0xff] }
  0x53   :  { %2013 = vmatpush3.bf16.msra.mxu1 %v2012_v15  ;;  %v209_v29 = vadd.f32 %v208_v27, %v207_v23  ;;  %v2030_v61 = vpack.c.bf16 %v473_v58, %v472_v57  ;;  %v257_v2 = vld [vmem:[#allocation2 + $0x8] sm:$0xff]  ;;  %v258_v4 = vld [vmem:[#allocation2 + $0x10] sm:$0xff]  ;;  %v259_v5 = vld [vmem:[#allocation2 + $0x18] sm:$0xff] }
  0x54   :  { %2014 = vmatprep.subr.bf16.mxu1 %v2321_v0  ;;  %223 = vperm.xlu0 %2111, %v198_v20   ;;  %v203_v34 = vrot.slane %v202_v28, 2  ;;  %v490_v62 = vrot.slane %v483_v59, %v2565_v60  ;;  %v1994_v3 = vpack.c.bf16 %v257_v2, %v256_v63  ;;  %v1998_v6 = vpack.c.bf16 %v259_v5, %v258_v4  ;;  %v1747_v7 = vld [vmem:[%s2953_s4] ss:$0 sm:$0xff]  ;;  %v342_v15 = vld [vmem:[#allocation5 + $0x8] sm:$0xff]  ;;  %v344_v22 = vld [vmem:[#allocation5 + $0x18] sm:$0xff] }
  0x55   :  { %1843 = vmatmul.mubr.msk.f32.vlgmr.msra.gmra.mrb[0].mxu0 %vm113_vm1, %v101_v18  ;;  %v210_v33 = vrot.slane %v209_v29, 2  ;;  %v341_v14 = vld [vmem:[#allocation5] sm:$0xff]  ;;  %v564_v43 = vld [vmem:[#allocation8 + $0x8] sm:$0xff]  ;;  %v566_v52 = vld [vmem:[#allocation8 + $0x18] sm:$0xff] }
  0x56   :  { %v204_v35 = vadd.f32 %v203_v34, %v202_v28  ;;  %1995 = vmatprep.subr.bf16.mxu0 %v1994_v3  ;;  %v2003_v18 = vpack.c.bf16 %v342_v15, %v341_v14  ;;  %v567_v55 = vld [vmem:[#allocation8 + $0x20] sm:$0xff]  ;;  %v568_v56 = vld [vmem:[#allocation8 + $0x28] sm:$0xff]  ;;  %v569_v58 = vld [vmem:[#allocation8 + $0x30] sm:$0xff] }
  0x57   :  { %2016 = vmatpush3.bf16.msra.mxu1 %v2015_v21  ;;  %v211_v36 = vadd.f32 %v210_v33, %v209_v29  ;;  %1997 = vmatpush3.bf16.msra.mxu0 %v1994_v3  ;;  %v343_v21 = vld [vmem:[#allocation5 + $0x10] sm:$0xff]  ;;  %v2039_v57 = vpack.c.bf16 %v568_v56, %v567_v55  ;;  %v570_v59 = vld [vmem:[#allocation8 + $0x38] sm:$0xff]  ;;  %v572_v63 = vld [vmem:[#allocation8 + $0x48] sm:$0xff] }
  0x58   :  { %2017 = vmatprep.subr.bf16.mxu1 %v2321_v0  ;;  %v205_v40 = vrot.slane %v204_v35, 1  ;;  %1999 = vmatprep.subr.bf16.mxu0 %v1998_v6  ;;  %v2006_v28 = vpack.c.bf16 %v344_v22, %v343_v21  ;;  %v573_v3 = vld [vmem:[#allocation8 + $0x50] sm:$0xff]  ;;  %v574_v4 = vld [vmem:[#allocation8 + $0x58] sm:$0xff]  ;;  %v873_v22 = vld [vmem:[%s2961_s12 + $0x8] sm:$0xff] }
  0x59   :  { %v212_v41 = vrot.slane %v211_v36, 1 }
  0x5a   :  { %v206_v45 = vadd.f32 %v205_v40, %v204_v35 }
  0x5b   :  { %2019 = vmatpush3.bf16.msra.mxu1 %v2018_v30  ;;  %v213_v46 = vadd.f32 %v212_v41, %v211_v36  ;;  %2001 = vmatpush3.bf16.msra.mxu0 %v1998_v6  ;;  %v563_v41 = vld [vmem:[#allocation8] sm:$0xff]  ;;  %v2048_v6 = vpack.c.bf16 %v574_v4, %v573_v3 }
  0x5c   :  { %2020 = vmatprep.subr.bf16.mxu1 %v2321_v0  ;;  %v214_v50 = vmax.f32 %v206_v45, 1.0  ;;  %2002 = vmatprep.subr.bf16.mxu0 %v2321_v0  ;;  %v2033_v49 = vpack.c.bf16 %v564_v43, %v563_v41  ;;  %v887_v41 = vld [vmem:[%s2961_s12 + $0x78] sm:$0xff] }
  0x5d   :  { %v215_v53 = vmax.f32 %v213_v46, 1.0 }
  0x5e   :  { %244 = vperm.xlu1 %2112, %v214_v50   ;;  %v565_v50 = vld [vmem:[#allocation8 + $0x10] sm:$0xff] }
  0x5f   :  { %2022 = vmatpush3.bf16.msra.mxu1 %v2021_v37 }
  0x60   :  { %2023 = vmatprep.subr.bf16.mxu1 %v2321_v0 }
  0x62   :  { %249 = vperm.xlu1 %2112, %v215_v53  }
  0x63   :  { %2025 = vmatpush3.bf16.msra.mxu1 %v2024_v47 }
  0x64   :  { %2026 = vmatprep.subr.bf16.mxu1 %v2321_v0 }
  0x67   :  { %2028 = vmatpush3.bf16.msra.mxu1 %v2027_v54  ;;  %v2036_v54 = vpack.c.bf16 %v566_v52, %v565_v50 }
  0x68   :  { %2029 = vmatprep.subr.bf16.mxu1 %v2321_v0 }
  0x6b   :  { %2031 = vmatpush3.bf16.msra.mxu1 %v2030_v61  ;;  %v2042_v61 = vpack.c.bf16 %v570_v59, %v569_v58 }
  0x6e   :  { %1900 = vmatmul.mubr.f32.vlgmr.msra.gmra.mrb[0].mxu1 %v490_v62  ;;  %v571_v62 = vld [vmem:[#allocation8 + $0x40] sm:$0xff] }
  0x6f   :  { %v2045_v2 = vpack.c.bf16 %v572_v63, %v571_v62 }
  0xcf   :  { %v219_v12 = vpop.permute.xlu0 %218 }
  0xd3   :  { %v224_v17 = vpop.permute.xlu0 %223 }
  0xdd   :  { %v245_v13 = vpop.permute.xlu1 %244 }
  0xe1   :  { %v250_v24 = vpop.permute.xlu1 %249 }
 0x128   :  { %v1844_v8 = vpop.f32.mrb[0].mxu0 }
 0x129   :  { %v192_v9 = vadd.f32 %v1844_v8, %v1747_v7  ;;  %v186_v10 = vpop.f32.mrb[1].mxu0  ;;  %v576_v8 = vld [vmem:[#allocation8 + $0x68] sm:$0xff] }
 0x12a   :  { %v187_v11 = vadd.f32 %v1747_v7, %v186_v10  ;;  %v575_v7 = vld [vmem:[#allocation8 + $0x60] sm:$0xff]  ;;  %v577_v10 = vld [vmem:[#allocation8 + $0x70] sm:$0xff] }
 0x12b   :  { %2113 = vtanh.f32 %v192_v9  ;;  %v2051_v9 = vpack.c.bf16 %v576_v8, %v575_v7 }
 0x12c   :  { %2115 = vtanh.f32 %v187_v11  ;;  %v578_v11 = vld [vmem:[#allocation8 + $0x78] sm:$0xff] }
 0x12d   :  { %2117 = vrcp.f32 %v250_v24  ;;  %v2054_v14 = vpack.c.bf16 %v578_v11, %v577_v10 }
 0x12e   :  { %2119 = vrcp.f32 %v245_v13  ;;  %v1596_v13 = vld [vmem:[#allocation7 + $0x8] sm:$0xff] }
 0x135   :  { %v2573_v16 = vpop.eup %2113 }
 0x136   :  { %v2575_v19 = vpop.eup %2115  ;;  %v227_v20 = vmul.f32 %v2573_v16, %v224_v17  ;;  %v1597_v17 = vld [vmem:[#allocation7 + $0x10] sm:$0xff] }
 0x137   :  { %v226_v23 = vmul.f32 %v2575_v19, %v219_v12  ;;  %1853 = vmatprep.mubr.msk.f32.mxu0 %vm113_vm1, %v2575_v19  ;;  %v2118_v44 = vpop.eup %2117  ;;  %v1595_v12 = vld [vmem:[#allocation7] sm:$0xff] }
 0x138   :  { %v235_v25 = vsel %vm113_vm1, %v227_v20, 0.0  ;;  %1854 = vmatmul.mubr.msk.f32.vlgmr.msra.gmra.mrb[2].mxu0 %vm113_vm1, %v2573_v16  ;;  %v2120_v46 = vpop.eup %2119  ;;  %v2088_v15 = vpack.c.bf16 %v1596_v13, %v1595_v12 }
 0x139   :  { %v228_v26 = vsel %vm113_vm1, %v226_v23, 0.0  ;;  %v236_v27 = vrot.slane %v235_v25, 4  ;;  %2004 = vmatpush3.bf16.msra.mxu0 %v2003_v18  ;;  %1864 = vmatprep.mubr.msk.f32.mxu0 %vm2322_vm0, %v2323_v1  ;;  %v1598_v18 = vld [vmem:[#allocation7 + $0x18] sm:$0xff]  ;;  %v874_v23 = vld [vmem:[%s2961_s12 + $0x10] sm:$0xff] }
 0x13a   :  { %v229_v29 = vrot.slane %v228_v26, 4  ;;  %2005 = vmatprep.subr.bf16.mxu0 %v2321_v0  ;;  %v2092_v21 = vpack.c.bf16 %v1598_v18, %v1597_v17 }
 0x13b   :  { %v237_v30 = vadd.f32 %v236_v27, %v235_v25 }
 0x13c   :  { %v230_v31 = vadd.f32 %v229_v29, %v228_v26  ;;  %v877_v26 = vld [vmem:[%s2961_s12 + $0x28] sm:$0xff]  ;;  %v879_v29 = vld [vmem:[%s2961_s12 + $0x38] sm:$0xff] }
 0x13d   :  { %v238_v32 = vrot.slane %v237_v30, 2  ;;  %2007 = vmatpush3.bf16.msra.mxu0 %v2006_v28  ;;  %v878_v28 = vld [vmem:[%s2961_s12 + $0x30] sm:$0xff] }
 0x13e   :  { %v231_v33 = vrot.slane %v230_v31, 2  ;;  %2032 = vmatprep.subr.bf16.mxu0 %v2321_v0 }
 0x13f   :  { %v239_v34 = vadd.f32 %v238_v32, %v237_v30  ;;  %v2068_v30 = vpack.c.bf16 %v879_v29, %v878_v28  ;;  %v881_v32 = vld [vmem:[%s2961_s12 + $0x48] sm:$0xff] }
 0x140   :  { %v232_v35 = vadd.f32 %v231_v33, %v230_v31  ;;  %v880_v31 = vld [vmem:[%s2961_s12 + $0x40] sm:$0xff] }
 0x141   :  { %v240_v36 = vrot.slane %v239_v34, 1  ;;  %v558_v37 = vpop.f32.mrb[0].mxu1  ;;  %v2072_v33 = vpack.c.bf16 %v881_v32, %v880_v31 }
 0x142   :  { %v233_v38 = vrot.slane %v232_v35, 1  ;;  %v1901_v39 = vpop.f32.mrb[1].mxu1 }
 0x143   :  { %v241_v40 = vadd.f32 %v240_v36, %v239_v34  ;;  %v882_v34 = vld [vmem:[%s2961_s12 + $0x50] sm:$0xff]  ;;  %v884_v36 = vld [vmem:[%s2961_s12 + $0x60] sm:$0xff] }
 0x144   :  { %v234_v45 = vadd.f32 %v233_v38, %v232_v35  ;;  %v883_v35 = vld [vmem:[%s2961_s12 + $0x58] sm:$0xff]  ;;  %v885_v38 = vld [vmem:[%s2961_s12 + $0x68] sm:$0xff] }
 0x145   :  { %v255_v47 = vmul.f32 %v2118_v44, %v241_v40  ;;  %v2080_v39 = vpack.c.bf16 %v885_v38, %v884_v36  ;;  %v886_v40 = vld [vmem:[%s2961_s12 + $0x70] sm:$0xff] }
 0x146   :  { %v253_v48 = vmul.f32 %v2120_v46, %v234_v45  ;;  %v2084_v43 = vpack.c.bf16 %v887_v41, %v886_v40  ;;  %v2326_v46 = vmov 1966171168  }
 0x148   :  { %v348_v53 = vsel %vm347_vm3, %v255_v47, %v253_v48  ;;  %v423_v47 = vunpack.c.l.s4 %v2326_v46 }
 0x149   :  { %1865 = vmatmul.mubr.msk.f32.vlgmr.msra.gmra.mrb[4].mxu0 %vm113_vm1, %v348_v53  ;;  %v2657_v53 = vsub.s32 0, %v2549_v51 }
 0x14a   :  { %2034 = vmatpush3.bf16.msra.mxu0 %v2033_v49  ;;  %1934 = vmatprep.mubr.msk.f32.mxu0 %vm2322_vm0, %v2323_v1  ;;  %v1753_v1 = vld [vmem:[%s2959_s10] ss:$0 sm:$0xff]  ;;  %v424_v48 = vunpack.c.0.s8 %v423_v47 }
 0x14b   :  { %2035 = vmatprep.subr.bf16.mxu0 %v2321_v0  ;;  %v559_v5 = vadd.f32 %v1753_v1, %v558_v37  ;;  %v2076_v37 = vpack.c.bf16 %v883_v35, %v882_v34 }
 0x14c   :  { %v427_v49 = vsub.s32 %v424_v48, %v2549_v51 }
 0x14d   :  { %2121 = vtanh.f32 %v559_v5 }
 0x14e   :  { %2037 = vmatpush3.bf16.msra.mxu0 %v2036_v54 }
 0x14f   :  { %2038 = vmatprep.subr.bf16.mxu0 %v2321_v0 }
 0x152   :  { %2040 = vmatpush3.bf16.msra.mxu0 %v2039_v57 }
 0x153   :  { %2041 = vmatprep.subr.bf16.mxu0 %v2321_v0 }
 0x156   :  { %2043 = vmatpush3.bf16.msra.mxu0 %v2042_v61 }
 0x157   :  { %2044 = vmatprep.subr.bf16.mxu0 %v2321_v0  ;;  %v2122_v20 = vpop.eup %2121 }
 0x15a   :  { %2046 = vmatpush3.bf16.msra.mxu0 %v2045_v2 }
 0x15b   :  { %2047 = vmatprep.subr.bf16.mxu0 %v2321_v0 }
 0x15e   :  { %2049 = vmatpush3.bf16.msra.mxu0 %v2048_v6 }
 0x15f   :  { %2050 = vmatprep.subr.bf16.mxu0 %v2321_v0 }
 0x162   :  { %2052 = vmatpush3.bf16.msra.mxu0 %v2051_v9 }
 0x163   :  { %2053 = vmatprep.subr.bf16.mxu0 %v2321_v0  ;;  %v872_v0 = vld [vmem:[%s2961_s12] sm:$0xff] }
 0x164   :  { %v2056_v24 = vpack.c.bf16 %v873_v22, %v872_v0 }
 0x166   :  { %2055 = vmatpush3.bf16.msra.mxu0 %v2054_v14  ;;  %2057 = vmatprep.subr.bf16.mxu1 %v2056_v24 }
 0x167   :  { %2089 = vmatprep.subr.bf16.mxu0 %v2088_v15  ;;  %2059 = vmatpush3.bf16.msra.mxu1 %v2056_v24 }
 0x169   :  { %1935 = vmatmul.mubr.f32.vlgmr.msra.gmra.mrb[6].mxu0 %v2122_v20 }
 0x16a   :  { %2091 = vmatpush3.bf16.msra.mxu0 %v2088_v15  ;;  %1983 = vmatprep.mubr.msk.f32.mxu0 %vm113_vm1, %v2575_v19  ;;  %v875_v19 = vld [vmem:[%s2961_s12 + $0x18] sm:$0xff] }
 0x16b   :  { %2093 = vmatprep.subr.bf16.mxu0 %v2092_v21  ;;  %v2060_v25 = vpack.c.bf16 %v875_v19, %v874_v23 }
 0x16d   :  { %2061 = vmatprep.subr.bf16.mxu1 %v2060_v25 }
 0x16e   :  { %2095 = vmatpush3.bf16.msra.mxu0 %v2092_v21  ;;  %2063 = vmatpush3.bf16.msra.mxu1 %v2060_v25 }
 0x171   :  { %1984 = vmatmul.mubr.msk.f32.vlgmr.msra.gmra.mrb[8].mxu0 %vm113_vm1, %v2573_v16  ;;  %v876_v16 = vld [vmem:[%s2961_s12 + $0x20] sm:$0xff] }
 0x172   :  { %v2064_v27 = vpack.c.bf16 %v877_v26, %v876_v16 }
 0x174   :  { %2065 = vmatprep.subr.bf16.mxu1 %v2064_v27 }
 0x175   :  { %2067 = vmatpush3.bf16.msra.mxu1 %v2064_v27 }
 0x176   :  { %2069 = vmatprep.subr.bf16.mxu1 %v2068_v30 }
 0x179   :  { %2071 = vmatpush3.bf16.msra.mxu1 %v2068_v30 }
 0x17a   :  { %2073 = vmatprep.subr.bf16.mxu1 %v2072_v33 }
 0x17d   :  { %2075 = vmatpush3.bf16.msra.mxu1 %v2072_v33 }
 0x17e   :  { %2077 = vmatprep.subr.bf16.mxu1 %v2076_v37 }
 0x181   :  { %2079 = vmatpush3.bf16.msra.mxu1 %v2076_v37 }
 0x182   :  { %2081 = vmatprep.subr.bf16.mxu1 %v2080_v39 }
 0x185   :  { %2083 = vmatpush3.bf16.msra.mxu1 %v2080_v39 }
 0x186   :  { %2085 = vmatprep.subr.bf16.mxu1 %v2084_v43 }
 0x189   :  { %2087 = vmatpush3.bf16.msra.mxu1 %v2084_v43 }
 0x20b   :  { %v1855_v44 = vpop.f32.mrb[2].mxu0 }
 0x20c   :  { %v332_v45 = vpop.f32.mrb[3].mxu0 }
 0x21c   :  { %v417_v50 = vpop.f32.mrb[4].mxu0 }
 0x21d   :  { %v428_v52 = vrot.slane %v417_v50, %v427_v49  ;;  %v1866_v54 = vpop.f32.mrb[5].mxu0 }
 0x21f   :  { %v429_v55 = vcombine.high %v428_v52, %v428_v52  ;;  %v436_v56 = vrot.slane %v428_v52, %v427_v49 }
 0x221   :  { %v443_v57 = vrot.slane %v429_v55, %v427_v49  ;;  %v447_v58 = vrot.slane %v436_v56, %v2657_v53 }
 0x223   :  { %v451_v59 = vrot.slane %v443_v57, %v2657_v53  ;;  %v2661_v61 = vadd.f32 %v447_v58, %v332_v45 }
 0x225   :  { %v2663_v62 = vadd.f32 %v1855_v44, %v451_v59  ;;  %v651_v1 = vcombine.high %v2661_v61, %v2661_v61  ;;  %v658_v3 = vrot.slane %v2661_v61, %v427_v49 }
 0x227   :  { %v700_v63 = vcombine.high %v2663_v62, %v2663_v62  ;;  %v707_v2 = vrot.slane %v2663_v62, %v427_v49  ;;  %v665_v5 = vrot.slane %v651_v1, %v427_v49  ;;  %v666_v7 = vcombine.high %v658_v3, %v658_v3 }
 0x228   :  { %v674_v13 = vrot.slane %v658_v3, %v427_v49 }
 0x229   :  { %v714_v4 = vrot.slane %v700_v63, %v427_v49  ;;  %v715_v6 = vcombine.high %v707_v2, %v707_v2  ;;  %v667_v9 = vcombine.high %v665_v5, %v665_v5  ;;  %v723_v10 = vrot.slane %v707_v2, %v427_v49 }
 0x22a   :  { %v688_v14 = vrot.slane %v666_v7, %v427_v49  ;;  %v681_v17 = vrot.slane %v665_v5, %v427_v49  ;;  %v696_v22 = vcombine.high %v674_v13, %v674_v13  ;;  %v763_v16 = vrot.slane %v674_v13, %v2657_v53 }
 0x22b   :  { %v716_v8 = vcombine.high %v714_v4, %v714_v4  ;;  %v730_v11 = vrot.slane %v714_v4, %v427_v49  ;;  %v737_v12 = vrot.slane %v715_v6, %v427_v49  ;;  %v695_v18 = vrot.slane %v667_v9, %v427_v49 }
 0x22c   :  { %v745_v20 = vcombine.high %v723_v10, %v723_v10  ;;  %v698_v23 = vcombine.high %v688_v14, %v688_v14  ;;  %v697_v19 = vcombine.high %v681_v17, %v681_v17  ;;  %v795_v26 = vrot.slane %v723_v10, %v2657_v53 }
 0x22d   :  { %v744_v15 = vrot.slane %v716_v8, %v427_v49  ;;  %v746_v21 = vcombine.high %v730_v11, %v730_v11  ;;  %v747_v0 = vcombine.high %v737_v12, %v737_v12  ;;  %v699_v25 = vcombine.high %v695_v18, %v695_v18 }
 0x22e   :  { %v799_v27 = vrot.slane %v737_v12, %v2657_v53  ;;  %v803_v28 = vrot.slane %v745_v20, %v2657_v53  ;;  %v811_v29 = vrot.slane %v730_v11, %v2657_v53  ;;  %v767_v34 = vrot.slane %v688_v14, %v2657_v53 }
 0x22f   :  { %v748_v24 = vcombine.high %v744_v15, %v744_v15  ;;  %v807_v31 = vrot.slane %v747_v0, %v2657_v53  ;;  %v815_v32 = vrot.slane %v744_v15, %v2657_v53  ;;  %v819_v33 = vrot.slane %v746_v21, %v2657_v53 }
 0x230   :  { %v771_v37 = vrot.slane %v696_v22, %v2657_v53  ;;  %v775_v38 = vrot.slane %v698_v23, %v2657_v53  ;;  %v779_v39 = vrot.slane %v681_v17, %v2657_v53  ;;  %v783_v41 = vrot.slane %v695_v18, %v2657_v53 }
 0x231   :  { %v823_v40 = vrot.slane %v748_v24, %v2657_v53  ;;  %v787_v43 = vrot.slane %v697_v19, %v2657_v53  ;;  %v791_v44 = vrot.slane %v699_v25, %v2657_v53 }
 0x23c   :  { %v645_v30 = vpop.f32.mrb[6].mxu0 }
 0x23d   :  { %v756_v35 = vrot.slane %v645_v30, %v2565_v60  ;;  %v1936_v36 = vpop.f32.mrb[7].mxu0 }
 0x23f   :  { %v757_v45 = vcombine.high %v756_v35, %v756_v35  ;;  %v840_v46 = vadd.f32 %v763_v16, %v756_v35  ;;  %v841_v47 = vadd.f32 %v767_v34, %v756_v35  ;;  %v842_v48 = vadd.f32 %v771_v37, %v756_v35 }
 0x240   :  { %v844_v49 = vadd.f32 %v779_v39, %v756_v35  ;;  %v845_v50 = vadd.f32 %v783_v41, %v756_v35  ;;  %v846_v52 = vadd.f32 %v787_v43, %v756_v35  ;;  %v847_v54 = vadd.f32 %v791_v44, %v756_v35 }
 0x241   :  { %v848_v55 = vadd.f32 %v795_v26, %v757_v45  ;;  %v849_v56 = vadd.f32 %v799_v27, %v757_v45  ;;  %v850_v57 = vadd.f32 %v803_v28, %v757_v45  ;;  %v852_v58 = vadd.f32 %v811_v29, %v757_v45 }
 0x242   :  { %v843_v59 = vadd.f32 %v775_v38, %v756_v35  ;;  %v851_v63 = vadd.f32 %v807_v31, %v757_v45  ;;  %v853_v1 = vadd.f32 %v815_v32, %v757_v45  ;;  %v854_v2 = vadd.f32 %v819_v33, %v757_v45 }
 0x243   :  { %2123 = vtanh.f32 %v848_v55  ;;  %v855_v3 = vadd.f32 %v823_v40, %v757_v45 }
 0x244   :  { %2125 = vtanh.f32 %v849_v56  ;;  %v1985_v4 = vpop.f32.mrb[8].mxu0 }
 0x245   :  { %v2689_v5 = vadd.f32 %v1985_v4, %v2663_v62  ;;  %v1665_v6 = vpop.f32.mrb[9].mxu0  ;;  %2127 = vtanh.f32 %v840_v46 }
 0x246   :  { %v2692_v7 = vadd.f32 %v1665_v6, %v2661_v61  ;;  %2129 = vtanh.f32 %v850_v57 }
 0x247   :  { %2131 = vtanh.f32 %v841_v47 }
 0x248   :  { %2133 = vtanh.f32 %v842_v48 }
 0x249   :  { %2135 = vtanh.f32 %v844_v49 }
 0x24a   :  { %2137 = vtanh.f32 %v845_v50 }
 0x24b   :  { %2139 = vtanh.f32 %v846_v52 }
 0x24c   :  { %2141 = vtanh.f32 %v847_v54 }
 0x24d   :  { %v2124_v8 = vpop.eup %2123  ;;  %2143 = vtanh.f32 %v852_v58 }
 0x24e   :  { %v2126_v9 = vpop.eup %2125  ;;  %2145 = vtanh.f32 %v843_v59 }
 0x24f   :  { %v938_v10 = vcombine.low %v2124_v8, %v2126_v9  ;;  %v2128_v11 = vpop.eup %2127  ;;  %2147 = vtanh.f32 %v851_v63 }
 0x250   :  { %v2130_v62 = vpop.eup %2129  ;;  %2149 = vtanh.f32 %v853_v1 }
 0x251   :  { %v2132_v12 = vpop.eup %2131  ;;  %2151 = vtanh.f32 %v854_v2  ;;  %v946_v28 = vrot.slane %v938_v10, %v2565_v60 }
 0x252   :  { %v2134_v61 = vpop.eup %2133  ;;  %v904_v13 = vcombine.low %v2128_v11, %v2132_v12  ;;  %2153 = vtanh.f32 %v855_v3 }
 0x253   :  { %v2136_v14 = vpop.eup %2135 }
 0x254   :  { %v2138_v15 = vpop.eup %2137  ;;  %v912_v25 = vrot.slane %v904_v13, %v2565_v60 }
 0x255   :  { %v2140_v17 = vpop.eup %2139  ;;  %v921_v18 = vcombine.low %v2136_v14, %v2138_v15 }
 0x256   :  { %v2142_v20 = vpop.eup %2141 }
 0x257   :  { %v2144_v21 = vpop.eup %2143  ;;  %v922_v0 = vcombine.low %v2140_v17, %v2142_v20  ;;  %v929_v22 = vrot.slane %v921_v18, %v2565_v60 }
 0x258   :  { %v2146_v23 = vpop.eup %2145 }
 0x259   :  { %v2148_v24 = vpop.eup %2147  ;;  %v905_v19 = vcombine.low %v2134_v61, %v2146_v23  ;;  %v936_v16 = vrot.slane %v922_v0, %v2565_v60 }
 0x25a   :  { %v2150_v26 = vpop.eup %2149  ;;  %v939_v27 = vcombine.low %v2130_v62, %v2148_v24 }
 0x25b   :  { %v2152_v29 = vpop.eup %2151  ;;  %v919_v30 = vrot.slane %v905_v19, %v2565_v60  ;;  %v937_v31 = vcombine.low %v929_v22, %v936_v16  ;;  %v955_v32 = vcombine.low %v2144_v21, %v2150_v26 }
 0x25c   :  { %v2154_v33 = vpop.eup %2153  ;;  %v953_v34 = vrot.slane %v939_v27, %v2565_v60 }
 0x25d   :  { %v920_v35 = vcombine.low %v912_v25, %v919_v30  ;;  %v956_v36 = vcombine.low %v2152_v29, %v2154_v33  ;;  %v963_v37 = vrot.slane %v955_v32, %v2565_v60 }
 0x25e   :  { %v954_v38 = vcombine.low %v946_v28, %v953_v34  ;;  %v1215_v28 = vand.u32 127, %v425_v42 }
 0x25f   :  { %1969 = vmatprep.mubr.f32.mxu1 %v920_v35  ;;  %v970_v39 = vrot.slane %v956_v36, %v2565_v60 }
 0x260   :  { %1970 = vmatmul.mubr.f32.vlgmr.msra.gmra.mrb[2].mxu1 %v937_v31  ;;  %v2792_v31 = vsub.s32 %v1215_v28, %v2549_v51  ;;  %v1317_v28 = vsub.s32 1, %v2549_v51 }
 0x261   :  { %1972 = vmatprep.mubr.f32.mxu1 %v954_v38  ;;  %v971_v40 = vcombine.low %v963_v37, %v970_v39 }
 0x264   :  { %1973 = vmatmul.mubr.f32.gmra.mrb[4].mxu1 %v971_v40 }
 0x333   :  { %v1971_v41 = vpop.f32.mrb[2].mxu1 }
 0x334   :  { %v2703_v43 = vrot.slane %v1971_v41, %v2565_v60  ;;  %v1042_v44 = vpop.f32.mrb[3].mxu1  ;;  %v1082_v46 = vcombine.high %v1971_v41, %v1971_v41 }
 0x335   :  { %v2706_v45 = vrot.slane %v1042_v44, %v2565_v60  ;;  %v1065_v59 = vcombine.high %v1042_v44, %v1042_v44 }
 0x336   :  { %v1162_v47 = vsel %vm1149_vm4, %v2703_v43, -inf  ;;  %v2712_v48 = vcombine.high %v2703_v43, %v2703_v43  ;;  %v2720_v55 = vrot.slane %v1082_v46, %v2565_v60 }
 0x337   :  { %1163 = vmax.xlane.f32.xlu1 %v1162_v47  ;;  %v1974_v49 = vpop.f32.mrb[4].mxu1  ;;  %v1150_v50 = vsel %vm1149_vm4, %v2706_v45, -inf  ;;  %v2733_v1 = vcombine.high %v2706_v45, %v2706_v45  ;;  %v2742_v6 = vrot.slane %v1065_v59, %v2565_v60 }
 0x338   :  { %v2717_v52 = vrot.slane %v1974_v49, %v2565_v60  ;;  %1151 = vmax.xlane.f32.xlu0 %v1150_v50  ;;  %v1052_v54 = vpop.f32.mrb[5].mxu1  ;;  %v1165_v56 = vsel %vm1149_vm4, %v2712_v48, -inf  ;;  %v1168_v63 = vsel %vm1149_vm4, %v2720_v55, -inf  ;;  %v1116_v2 = vcombine.high %v1974_v49, %v1974_v49 }
 0x339   :  { %v2727_v58 = vrot.slane %v1052_v54, %v2565_v60  ;;  %v1153_v8 = vsel %vm1149_vm4, %v2733_v1, -inf  ;;  %v1156_v11 = vsel %vm1149_vm4, %v2742_v6, -inf  ;;  %v2755_v62 = vcombine.high %v2742_v6, %v2742_v6 }
 0x33a   :  { %v1186_v57 = vsel %vm1149_vm4, %v2717_v52, -inf  ;;  %v2739_v4 = vcombine.high %v2717_v52, %v2717_v52  ;;  %v2747_v9 = vrot.slane %v1116_v2, %v2565_v60  ;;  %v1099_v12 = vcombine.high %v1052_v54, %v1052_v54 }
 0x33b   :  { %1166 = vmax.xlane.f32.xlu1 %v1165_v56  ;;  %v1174_v3 = vsel %vm1149_vm4, %v2727_v58, -inf  ;;  %v2761_v13 = vcombine.high %v2727_v58, %v2727_v58  ;;  %v1159_v14 = vsel %vm1149_vm4, %v2755_v62, -inf  ;;  %v2767_v15 = vcombine.high %v2720_v55, %v2720_v55 }
 0x33c   :  { %1187 = vmax.xlane.f32.xlu0 %v1186_v57  ;;  %v1189_v10 = vsel %vm1149_vm4, %v2739_v4, -inf  ;;  %v1192_v61 = vsel %vm1149_vm4, %v2747_v9, -inf  ;;  %v2770_v17 = vrot.slane %v1099_v12, %v2565_v60  ;;  %v2786_v22 = vcombine.high %v2747_v9, %v2747_v9 }
 0x33d   :  { %v1177_v18 = vsel %vm1149_vm4, %v2761_v13, -inf  ;;  %v1171_v20 = vsel %vm1149_vm4, %v2767_v15, -inf }
 0x33e   :  { %v1180_v21 = vsel %vm1149_vm4, %v2770_v17, -inf  ;;  %v2780_v0 = vcombine.high %v2770_v17, %v2770_v17  ;;  %v1195_v23 = vsel %vm1149_vm4, %v2786_v22, -inf }
 0x33f   :  { %1169 = vmax.xlane.f32.xlu1 %v1168_v63 }
 0x340   :  { %1175 = vmax.xlane.f32.xlu0 %v1174_v3  ;;  %v1183_v60 = vsel %vm1149_vm4, %v2780_v0, -inf }
 0x343   :  { %1154 = vmax.xlane.f32.xlu1 %v1153_v8 }
 0x344   :  { %1190 = vmax.xlane.f32.xlu0 %v1189_v10 }
 0x347   :  { %1157 = vmax.xlane.f32.xlu1 %v1156_v11 }
 0x348   :  { %1193 = vmax.xlane.f32.xlu0 %v1192_v61 }
 0x34b   :  { %1160 = vmax.xlane.f32.xlu1 %v1159_v14 }
 0x34c   :  { %1178 = vmax.xlane.f32.xlu0 %v1177_v18 }
 0x34f   :  { %1172 = vmax.xlane.f32.xlu1 %v1171_v20 }
 0x350   :  { %1181 = vmax.xlane.f32.xlu0 %v1180_v21 }
 0x354   :  { %1184 = vmax.xlane.f32.xlu0 %v1183_v60 }
 0x358   :  { %1196 = vmax.xlane.f32.xlu0 %v1195_v23 }
 0x3c4   :  { %v1164_v24 = vpop.xlane.xlu1 %1163 }
 0x3c5   :  { %v1152_v19 = vpop.xlane.xlu0 %1151  ;;  %v1235_v40 = vrot.slane %v1164_v24, %v2792_v31 }
 0x3c6   :  { %v1219_v36 = vrot.slane %v1152_v19, %v2792_v31 }
 0x3c8   :  { %v1167_v25 = vpop.xlane.xlu1 %1166 }
 0x3c9   :  { %v1188_v16 = vpop.xlane.xlu0 %1187  ;;  %v1239_v44 = vrot.slane %v1167_v25, %v2792_v31 }
 0x3ca   :  { %v1267_v14 = vrot.slane %v1188_v16, %v2792_v31 }
 0x3cc   :  { %v1170_v26 = vpop.xlane.xlu1 %1169 }
 0x3cd   :  { %v1176_v27 = vpop.xlane.xlu0 %1175  ;;  %v1243_v47 = vrot.slane %v1170_v26, %v2792_v31 }
 0x3ce   :  { %v1251_v8 = vrot.slane %v1176_v27, %v2792_v31 }
 0x3d0   :  { %v1155_v29 = vpop.xlane.xlu1 %1154 }
 0x3d1   :  { %v1191_v30 = vpop.xlane.xlu0 %1190  ;;  %v1223_v33 = vrot.slane %v1155_v29, %v2792_v31  ;;  %v1321_v29 = vsub.s32 2, %v2549_v51 }
 0x3d2   :  { %v1271_v20 = vrot.slane %v1191_v30, %v2792_v31  ;;  %v1325_v30 = vsub.s32 3, %v2549_v51 }
 0x3d3   :  { %v1280_v38 = vsel %vm347_vm3, %v1223_v33, %v1219_v36  ;;  %v1329_v33 = vsub.s32 4, %v2549_v51 }
 0x3d4   :  { %v1158_v32 = vpop.xlane.xlu1 %1157 }
 0x3d5   :  { %v1194_v34 = vpop.xlane.xlu0 %1193  ;;  %v1227_v35 = vrot.slane %v1158_v32, %v2792_v31 }
 0x3d6   :  { %v1275_v60 = vrot.slane %v1194_v34, %v2792_v31 }
 0x3d7   :  { %v1282_v41 = vsel %vm1281_vm5, %v1227_v35, %v1280_v38 }
 0x3d8   :  { %v1161_v37 = vpop.xlane.xlu1 %1160 }
 0x3d9   :  { %v1231_v42 = vrot.slane %v1161_v37, %v2792_v31  ;;  %v1179_v39 = vpop.xlane.xlu0 %1178 }
 0x3da   :  { %v1255_v59 = vrot.slane %v1179_v39, %v2792_v31 }
 0x3db   :  { %v1284_v46 = vsel %vm1283_vm6, %v1231_v42, %v1282_v41  ;;  %v1333_v41 = vsub.s32 5, %v2549_v51 }
 0x3dc   :  { %v1286_v49 = vsel %vm1285_vm7, %v1235_v40, %v1284_v46  ;;  %v1173_v50 = vpop.xlane.xlu1 %1172  ;;  %v1293_v12 = vsel %vm347_vm3, %v1255_v59, %v1251_v8 }
 0x3dd   :  { %v1247_v54 = vrot.slane %v1173_v50, %v2792_v31  ;;  %v1182_v56 = vpop.xlane.xlu0 %1181  ;;  %v1288_v57 = vsel %vm1287_vm8, %v1239_v44, %v1286_v49 }
 0x3de   :  { %v1290_v63 = vsel %vm1289_vm9, %v1243_v47, %v1288_v57  ;;  %v1259_v2 = vrot.slane %v1182_v56, %v2792_v31 }
 0x3df   :  { %v1292_v3 = vsel %vm1291_vm10, %v1247_v54, %v1290_v63  ;;  %v1337_v63 = vsub.s32 6, %v2549_v51 }
 0x3e0   :  { %v1303_v10 = vsel %vm1302_vm11, %v1292_v3, -inf  ;;  %v1294_v18 = vsel %vm1281_vm5, %v1259_v2, %v1293_v12 }
 0x3e1   :  { %1304 = vmax.xlane.f32.xlu1 %v1303_v10  ;;  %v1185_v11 = vpop.xlane.xlu0 %1184 }
 0x3e2   :  { %v1263_v61 = vrot.slane %v1185_v11, %v2792_v31 }
 0x3e4   :  { %v1295_v21 = vsel %vm1283_vm6, %v1263_v61, %v1294_v18 }
 0x3e5   :  { %v1296_v23 = vsel %vm1285_vm7, %v1267_v14, %v1295_v21  ;;  %v1197_v24 = vpop.xlane.xlu0 %1196 }
 0x3e6   :  { %v1279_v19 = vrot.slane %v1197_v24, %v2792_v31  ;;  %v1297_v25 = vsel %vm1287_vm8, %v1271_v20, %v1296_v23 }
 0x3e7   :  { %v1298_v26 = vsel %vm1289_vm9, %v1275_v60, %v1297_v25 }
 0x3e8   :  { %v1299_v27 = vsel %vm1291_vm10, %v1279_v19, %v1298_v26 }
 0x3e9   :  { %v1306_v16 = vsel %vm1302_vm11, %v1299_v27, -inf }
 0x3ea   :  { %1307 = vmax.xlane.f32.xlu0 %v1306_v16 }
 0x46e   :  { %v2829_v32 = vpop.xlane.xlu1 %1304 }
 0x46f   :  { %v1314_v34 = vrot.slane %v2829_v32, %v2657_v53  ;;  %v1318_v35 = vrot.slane %v2829_v32, %v1317_v28  ;;  %v1322_v36 = vrot.slane %v2829_v32, %v1321_v29  ;;  %v1326_v37 = vrot.slane %v2829_v32, %v1325_v30 }
 0x470   :  { %v1330_v40 = vrot.slane %v2829_v32, %v1329_v33 }
 0x471   :  { %v1391_v38 = vsub.f32 %v2706_v45, %v1314_v34  ;;  %v1392_v42 = vsub.f32 %v2733_v1, %v1318_v35  ;;  %v1393_v39 = vsub.f32 %v2742_v6, %v1322_v36  ;;  %v1394_v49 = vsub.f32 %v2755_v62, %v1326_v37 }
 0x472   :  { %v1395_v45 = vsub.f32 %v2703_v43, %v1330_v40  ;;  %v1334_v1 = vrot.slane %v2829_v32, %v1333_v41 }
 0x473   :  { %v1407_v44 = vmul.f32 1.442695, %v1391_v38  ;;  %v1409_v46 = vmul.f32 1.442695, %v1392_v42  ;;  %v1411_v47 = vmul.f32 1.442695, %v1393_v39 }
 0x474   :  { %v1413_v54 = vmul.f32 1.442695, %v1394_v49  ;;  %v1415_v2 = vmul.f32 1.442695, %v1395_v45  ;;  %v1396_v3 = vsub.f32 %v2712_v48, %v1334_v1 }
 0x475   :  { %2155 = vpow2.f32 %v1407_v44 }
 0x476   :  { %2157 = vpow2.f32 %v1409_v46  ;;  %v1417_v14 = vmul.f32 1.442695, %v1396_v3 }
 0x477   :  { %v2843_v50 = vpop.xlane.xlu0 %1307  ;;  %2159 = vpow2.f32 %v1411_v47 }
 0x478   :  { %v1350_v6 = vrot.slane %v2843_v50, %v1317_v28  ;;  %v1354_v56 = vrot.slane %v2843_v50, %v1321_v29  ;;  %v1358_v57 = vrot.slane %v2843_v50, %v1325_v30  ;;  %2161 = vpow2.f32 %v1413_v54 }
 0x479   :  { %v1346_v43 = vrot.slane %v2843_v50, %v2657_v53  ;;  %v1362_v12 = vrot.slane %v2843_v50, %v1329_v33  ;;  %v1366_v48 = vrot.slane %v2843_v50, %v1333_v41  ;;  %v1370_v27 = vrot.slane %v2843_v50, %v1337_v63 }
 0x47a   :  { %v1400_v59 = vsub.f32 %v2761_v13, %v1350_v6  ;;  %v1401_v62 = vsub.f32 %v2770_v17, %v1354_v56  ;;  %v1402_v11 = vsub.f32 %v2780_v0, %v1358_v57  ;;  %v1338_v13 = vrot.slane %v2829_v32, %v1337_v63 }
 0x47b   :  { %v1341_v17 = vsub.s32 7, %v2549_v51  ;;  %v1399_v18 = vsub.f32 %v2727_v58, %v1346_v43  ;;  %v1403_v0 = vsub.f32 %v2717_v52, %v1362_v12  ;;  %v1404_v19 = vsub.f32 %v2739_v4, %v1366_v48 }
 0x47c   :  { %v1425_v8 = vmul.f32 1.442695, %v1400_v59  ;;  %v1427_v10 = vmul.f32 1.442695, %v1401_v62  ;;  %v1429_v21 = vmul.f32 1.442695, %v1402_v11  ;;  %v1397_v58 = vsub.f32 %v2720_v55, %v1338_v13 }
 0x47d   :  { %v1342_v51 = vrot.slane %v2829_v32, %v1341_v17  ;;  %v1423_v24 = vmul.f32 1.442695, %v1399_v18  ;;  %v1431_v26 = vmul.f32 1.442695, %v1403_v0  ;;  %v1433_v28 = vmul.f32 1.442695, %v1404_v19 }
 0x47e   :  { %2163 = vpow2.f32 %v1425_v8  ;;  %v1419_v16 = vmul.f32 1.442695, %v1397_v58  ;;  %v1405_v55 = vsub.f32 %v2747_v9, %v1370_v27  ;;  %v1374_v4 = vrot.slane %v2843_v50, %v1341_v17 }
 0x47f   :  { %v2156_v61 = vpop.eup %2155  ;;  %2165 = vpow2.f32 %v1415_v2  ;;  %v1398_v29 = vsub.f32 %v2767_v15, %v1342_v51 }
 0x480   :  { %v2158_v20 = vpop.eup %2157  ;;  %v1439_v53 = vsel %vm1149_vm4, %v2156_v61, 0.0  ;;  %2167 = vpow2.f32 %v1427_v10  ;;  %v1435_v15 = vmul.f32 1.442695, %v1405_v55  ;;  %v1406_v42 = vsub.f32 %v2786_v22, %v1374_v4 }
 0x481   :  { %v2160_v60 = vpop.eup %2159  ;;  %1440 = vadd.xlane.f32.xlu1 %v1439_v53  ;;  %v1442_v23 = vsel %vm1149_vm4, %v2158_v20, 0.0  ;;  %2169 = vpow2.f32 %v1417_v14  ;;  %v1421_v37 = vmul.f32 1.442695, %v1398_v29 }
 0x482   :  { %1443 = vadd.xlane.f32.xlu0 %v1442_v23  ;;  %v1445_v25 = vsel %vm1149_vm4, %v2160_v60, 0.0  ;;  %2171 = vpow2.f32 %v1429_v21  ;;  %v2162_v52 = vpop.eup %2161  ;;  %v1437_v44 = vmul.f32 1.442695, %v1406_v42 }
 0x483   :  { %2173 = vpow2.f32 %v1423_v24  ;;  %v1448_v33 = vsel %vm1149_vm4, %v2162_v52, 0.0 }
 0x484   :  { %2175 = vpow2.f32 %v1431_v26 }
 0x485   :  { %1446 = vadd.xlane.f32.xlu1 %v1445_v25  ;;  %2177 = vpow2.f32 %v1419_v16 }
 0x486   :  { %2179 = vpow2.f32 %v1433_v28 }
 0x487   :  { %2181 = vpow2.f32 %v1421_v37  ;;  %v1756_v37 = vld [vmem:[%s2957_s8] ss:$0 sm:$0xff] }
 0x488   :  { %v2164_v30 = vpop.eup %2163  ;;  %2183 = vpow2.f32 %v1435_v15 }
 0x489   :  { %v2166_v34 = vpop.eup %2165  ;;  %1449 = vadd.xlane.f32.xlu1 %v1448_v33  ;;  %v1466_v35 = vsel %vm1149_vm4, %v2164_v30, 0.0  ;;  %2185 = vpow2.f32 %v1437_v44 }
 0x48a   :  { %v2168_v36 = vpop.eup %2167  ;;  %1467 = vadd.xlane.f32.xlu0 %v1466_v35  ;;  %v1451_v38 = vsel %vm1149_vm4, %v2166_v34, 0.0  ;;  %2187 = vtanh.f32 %v2692_v7 }
 0x48b   :  { %v2170_v39 = vpop.eup %2169  ;;  %v1469_v9 = vsel %vm1149_vm4, %v2168_v36, 0.0  ;;  %2189 = vtanh.f32 %v2689_v5 }
 0x48c   :  { %v2172_v40 = vpop.eup %2171  ;;  %v1454_v41 = vsel %vm1149_vm4, %v2170_v39, 0.0 }
 0x48d   :  { %1452 = vadd.xlane.f32.xlu1 %v1451_v38  ;;  %v2174_v46 = vpop.eup %2173  ;;  %v1472_v47 = vsel %vm1149_vm4, %v2172_v40, 0.0 }
 0x48e   :  { %1470 = vadd.xlane.f32.xlu0 %v1469_v9  ;;  %v2176_v49 = vpop.eup %2175  ;;  %v1463_v54 = vsel %vm1149_vm4, %v2174_v46, 0.0 }
 0x48f   :  { %v2178_v22 = vpop.eup %2177  ;;  %v1475_v45 = vsel %vm1149_vm4, %v2176_v49, 0.0 }
 0x490   :  { %v2180_v1 = vpop.eup %2179  ;;  %v1457_v6 = vsel %vm1149_vm4, %v2178_v22, 0.0 }
 0x491   :  { %1455 = vadd.xlane.f32.xlu1 %v1454_v41  ;;  %v2182_v56 = vpop.eup %2181  ;;  %v1478_v57 = vsel %vm1149_vm4, %v2180_v1, 0.0 }
 0x492   :  { %1473 = vadd.xlane.f32.xlu0 %v1472_v47  ;;  %v2184_v59 = vpop.eup %2183  ;;  %v1460_v62 = vsel %vm1149_vm4, %v2182_v56, 0.0 }
 0x493   :  { %v1481_v63 = vsel %vm1149_vm4, %v2184_v59, 0.0  ;;  %v2186_v2 = vpop.eup %2185 }
 0x494   :  { %v1484_v3 = vsel %vm1149_vm4, %v2186_v2, 0.0  ;;  %v2188_v55 = vpop.eup %2187 }
 0x495   :  { %1464 = vadd.xlane.f32.xlu1 %v1463_v54  ;;  %v1685_v41 = vmul.f32 %v2188_v55, %v1756_v37  ;;  %v2190_v46 = vpop.eup %2189 }
 0x496   :  { %1476 = vadd.xlane.f32.xlu0 %v1475_v45 }
 0x497   :  { %v1687_v22 = vsel %vm113_vm1, %v1685_v41, 0.0 }
 0x499   :  { %1458 = vadd.xlane.f32.xlu1 %v1457_v6  ;;  %v1686_v6 = vmul.f32 %v2190_v46, %v1756_v37 }
 0x49a   :  { %1479 = vadd.xlane.f32.xlu0 %v1478_v57 }
 0x49b   :  { %v1690_v56 = vsel %vm113_vm1, %v1686_v6, 0.0 }
 0x49d   :  { %1461 = vadd.xlane.f32.xlu1 %v1460_v62 }
 0x49e   :  { %1482 = vadd.xlane.f32.xlu0 %v1481_v63 }
 0x4a2   :  { %1485 = vadd.xlane.f32.xlu0 %v1484_v3 }
 0x50e   :  { %v1441_v43 = vpop.xlane.xlu1 %1440 }
 0x50f   :  { %v1444_v10 = vpop.xlane.xlu0 %1443  ;;  %v1506_v48 = vrot.slane %v1441_v43, %v2792_v31  ;;  %v2195_v43 = vld [vmem:[%s2951_s2] sm:$0xff] }
 0x510   :  { %v1510_v20 = vrot.slane %v1444_v10, %v2792_v31  ;;  %vm1693_vm12 = vcmp.gt.f32.partialorder %v2195_v43, 0.5 }
 0x512   :  { %v1447_v8 = vpop.xlane.xlu1 %1446  ;;  %v1567_v19 = vsel %vm347_vm3, %v1510_v20, %v1506_v48 }
 0x513   :  { %v1514_v60 = vrot.slane %v1447_v8, %v2792_v31 }
 0x515   :  { %v1568_v52 = vsel %vm1281_vm5, %v1514_v60, %v1567_v19 }
 0x516   :  { %v1450_v11 = vpop.xlane.xlu1 %1449 }
 0x517   :  { %v1468_v12 = vpop.xlane.xlu0 %1467  ;;  %v1518_v23 = vrot.slane %v1450_v11, %v2792_v31 }
 0x518   :  { %v1542_v53 = vrot.slane %v1468_v12, %v2792_v31 }
 0x519   :  { %v1569_v29 = vsel %vm1283_vm6, %v1518_v23, %v1568_v52 }
 0x51a   :  { %v1453_v13 = vpop.xlane.xlu1 %1452 }
 0x51b   :  { %v1471_v17 = vpop.xlane.xlu0 %1470  ;;  %v1522_v7 = vrot.slane %v1453_v13, %v2792_v31 }
 0x51c   :  { %v1546_v51 = vrot.slane %v1471_v17, %v2792_v31 }
 0x51d   :  { %v1570_v5 = vsel %vm1285_vm7, %v1522_v7, %v1569_v29 }
 0x51e   :  { %v1456_v61 = vpop.xlane.xlu1 %1455 }
 0x51f   :  { %v1474_v14 = vpop.xlane.xlu0 %1473  ;;  %v1526_v25 = vrot.slane %v1456_v61, %v2792_v31  ;;  %v2196_v61 = vld [vmem:[%s2951_s2 + $0x8] sm:$0xff]  ;;  %s2327_s2 = smov [#allocation10]  }
 0x520   :  { %v1550_v16 = vrot.slane %v1474_v14, %v2792_v31  ;;  %vm1694_vm13 = vcmp.gt.f32.partialorder %v2196_v61, 0.5  ;;  %s1736_s19 = sshll.u32 %s2327_s2, 4  ;;  %s1737_s19 = int_to_ptr.vmem [resolvable:$true] %s1736_s19 }
 0x521   :  { %v1571_v4 = vsel %vm1287_vm8, %v1526_v25, %v1570_v5  ;;  %s2285_s23 = scalar_lea.vmem %s1737_s19, 128  ;;  %p2290_p5 = scmp.lt.s32.totalorder %s1737_s19, %s1737_s19 }
 0x522   :  { %v1465_v18 = vpop.xlane.xlu1 %1464  ;;  %p2286_p4 = scmp.ne.s32.totalorder %s1737_s19, %s2285_s23  ;;  %p2291_p6 = scmp.lt.s32.totalorder %s2285_s23, %s2285_s23 }
 0x523   :  { %v1538_v21 = vrot.slane %v1465_v18, %v2792_v31  ;;  %v1477_v0 = vpop.xlane.xlu0 %1476 }
 0x524   :  { %v1554_v34 = vrot.slane %v1477_v0, %v2792_v31  ;;  %p2292_p7 = por %p2291_p6, %p2290_p5 }
 0x525   :  { %v1574_v24 = vsel %vm347_vm3, %v1542_v53, %v1538_v21 }
 0x526   :  { %v1459_v58 = vpop.xlane.xlu1 %1458  ;;  %v1575_v26 = vsel %vm1281_vm5, %v1546_v51, %v1574_v24  ;;  %p2293_p8 = pnand %p2292_p7, %p2286_p4 }
 0x527   :  { %v1480_v27 = vpop.xlane.xlu0 %1479  ;;  %v1530_v28 = vrot.slane %v1459_v58, %v2792_v31  ;;  %v1576_v30 = vsel %vm1283_vm6, %v1550_v16, %v1575_v26 }
 0x528   :  { %v1558_v38 = vrot.slane %v1480_v27, %v2792_v31  ;;  %v1577_v42 = vsel %vm1285_vm7, %v1554_v34, %v1576_v30 }
 0x529   :  { %v1572_v15 = vsel %vm1289_vm9, %v1530_v28, %v1571_v4 }
 0x52a   :  { %v1462_v33 = vpop.xlane.xlu1 %1461  ;;  %v1578_v47 = vsel %vm1287_vm8, %v1558_v38, %v1577_v42 }
 0x52b   :  { %v1534_v35 = vrot.slane %v1462_v33, %v2792_v31  ;;  %v1483_v36 = vpop.xlane.xlu0 %1482 }
 0x52c   :  { %v1562_v39 = vrot.slane %v1483_v36, %v2792_v31 }
 0x52d   :  { %v1573_v9 = vsel %vm1291_vm10, %v1534_v35, %v1572_v15 }
 0x52e   :  { %v1583_v40 = vsel %vm1302_vm11, %v1573_v9, 0.0  ;;  %v1579_v54 = vsel %vm1289_vm9, %v1562_v39, %v1578_v47 }
 0x52f   :  { %1584 = vadd.xlane.f32.xlu1 %v1583_v40  ;;  %v1486_v44 = vpop.xlane.xlu0 %1485 }
 0x530   :  { %v1566_v49 = vrot.slane %v1486_v44, %v2792_v31 }
 0x532   :  { %v1580_v45 = vsel %vm1291_vm10, %v1566_v49, %v1579_v54 }
 0x533   :  { %1688 = vadd.xlane.f32.xlu1 %v1687_v22  ;;  %v1586_v1 = vsel %vm1302_vm11, %v1580_v45, 0.0 }
 0x534   :  { %1587 = vadd.xlane.f32.xlu0 %v1586_v1 }
 0x538   :  { %1691 = vadd.xlane.f32.xlu0 %v1690_v56 }
 0x5bc   :  { %v1585_v57 = vpop.xlane.xlu1 %1584 }
 0x5bd   :  { %2191 = vlog2.f32 %v1585_v57 }
 0x5c0   :  { %v1689_v3 = vpop.xlane.xlu1 %1688 }
 0x5c1   :  { %v1588_v59 = vpop.xlane.xlu0 %1587 }
 0x5c2   :  { %2193 = vlog2.f32 %v1588_v59 }
 0x5c5   :  { %v1692_v17 = vpop.xlane.xlu0 %1691 }
 0x5c7   :  { %v2192_v62 = vpop.eup %2191 }
 0x5c8   :  { %v1590_v63 = vmul.f32 0.6931472, %v2192_v62 }
 0x5ca   :  { %v1593_v2 = vadd.f32 %v1590_v63, %v2829_v32 }
 0x5cc   :  { %v2194_v8 = vpop.eup %2193  ;;  %v1695_v10 = vsub.f32 %v1593_v2, %v1689_v3 }
 0x5cd   :  { %v1592_v11 = vmul.f32 0.6931472, %v2194_v8 }
 0x5ce   :  { %v1697_v12 = vsel %vm1693_vm12, %v1695_v10, 0.0 }
 0x5cf   :  { %v1594_v13 = vadd.f32 %v1592_v11, %v2843_v50  ;;  %1702 = vperm.xlu1 %2112, %v1697_v12  }
 0x5d1   :  { %v1696_v32 = vsub.f32 %v1594_v13, %v1692_v17 }
 0x5d3   :  { %v1698_v14 = vsel %vm1694_vm13, %v1696_v32, 0.0 }
 0x5d4   :  { %1705 = vperm.xlu0 %2111, %v1698_v14  }
 0x64e   :  { %v1703_v18 = vpop.permute.xlu1 %1702 }
 0x64f   :  { %v1710_v20 = vrot.slane %v1703_v18, %v2792_v31 }
 0x653   :  { %v1706_v48 = vpop.permute.xlu0 %1705 }
 0x654   :  { %v1714_v53 = vrot.slane %v1706_v48, %v2792_v31 }
 0x656   :  { %v1715_v21 = vsel %vm347_vm3, %v1714_v53, %v1710_v20 }
 0x657   :  { %v1718_v50 = vsel %vm1717_vm14, %v1715_v21, 0.0 }
 0x658   :  { %1719 = vadd.xlane.f32.xlu1 %v1718_v50 }
 0x6e5   :  { %v1720_v0 = vpop.xlane.xlu1 %1719 }
 0x6e6   :  { %v1721_v60 = vrot.slane %v1720_v0, 4 }
 0x6e8   :  { %v1722_v23 = vadd.f32 %v1721_v60, %v1720_v0 }
 0x6ea   :  { %v1723_v51 = vrot.slane %v1722_v23, 2 }
 0x6ec   :  { %v1724_v24 = vadd.f32 %v1723_v51, %v1722_v23 }
 0x6ee   :  { %v1725_v7 = vrot.slane %v1724_v24, 1 }
 0x6f0   :  { %v1726_v58 = vadd.f32 %v1725_v7, %v1724_v24 }
 0x6f2   :  { %2096 = vpush %v1726_v58 }
 0x723   :  { %s2097_s3 = spop %2096 }
 0x724   :  { %v1728_v19 = vstv %s2097_s3 }
 0x725   :  { %1729 = vst [vmem:[#allocation10] sm:$0xff] %v1728_v19 }
 0x726   :  { %2296 = shalt.err (!%p2293_p8)
}
 0x727   :  { %s2297_s7 = scalar_lea.hbm %s2962_s13, 128 }
 0x728   :  { %p2298_p9 = scmp.ne.s32.totalorder %s2962_s13, %s2297_s7  ;;  %p2301_p10 = scmp.lt.u32.totalorder %s2297_s7, %s2962_s13 }
 0x72a   :  { %p2303_p11 = pnand %p2301_p10, %p2298_p9 }
 0x72c   :  { %2306 = shalt.err (!%p2303_p11)
}
 0x72d   :  { %1739 = dma.vmem_to_hbm [thread:$0]  %s1737_s19, 128, %s2962_s13, [#allocation4]  }
 0x72e   :  { %2313 = dma.done.wait [#allocation4], 128  }
 0x72f   :  { %2314 = vsyncadd [#allocation4], 4294967168 }
 0x730   :  { %1743 = vsyncpa [#allocation3], 1 }
 0x731   :  { %1744 = vsyncpa [#allocation6], 1 }
 0x732   :  { %1745 = vsyncpa [#allocation9], 1 }
 0x733   :  { %1746 = vsyncpa [#allocation4], 1 }

</bundles_post_ra>
